<compile_context>
chip_gen: v6e
topology: v6e:2x2x1
jax: 0.10.0
libtpu: 0.0.40
codegen_flags: <defaults>
</compile_context>

<pallas_src>
import functools

import jax
import jax.numpy as jnp
from jax.experimental import pallas as pl
from jax.experimental.pallas import tpu as pltpu


def _conv_cat_kernel(m_ref, x_ref, w1_ref, g1_ref, b1_ref,
                     w2_ref, g2_ref, b2_ref, o_ref, *, eps, img_w):
    """Fused (conv3x3 + BN(batch stats) + ReLU) x 2, everything in vregs/VMEM.

    m_ref : (9, 1, H*W)        0/1 border masks, one per conv tap
    x_ref : (N, Cin, H*W)      NCHW input, spatial flattened on lanes
    w*_ref: (9, Cout, Cin)     conv weights, tap-major, (cout, cin) per tap
    g*/b* : (Cout, 1)          BN gamma / beta (column => lane-broadcastable)
    o_ref : (N*Cout, H*W)      lane-dense output slab (free reshape to NCHW)
    """
    N, _, HW = x_ref.shape
    f32 = jnp.float32
    ones_col = jnp.ones((HW, 1), f32)           # MXU lane-reduction helper
    inv_cnt = 1.0 / (N * HW)

    def conv_bn_relu(xs, w_ref, g_ref, b_ref):
        cout = w_ref.shape[1]
        accs = [jnp.zeros((cout, HW), f32) for _ in range(N)]

        # 3x3 conv = 9 shifted-tap matmuls.  Shifts are lane rolls (XLU),
        # halo is a precomputed border mask (VPU), contraction is on the MXU.
        for kh in range(3):
            for kw in range(3):
                t = kh * 3 + kw
                d = (kh - 1) * img_w + (kw - 1)     # lane offset of this tap
                wt = w_ref[t]                       # (cout, cin)
                mt = m_ref[t] if d != 0 else None   # (1, HW)
                for n in range(N):
                    xt = xs[n]
                    if d != 0:
                        xt = pltpu.roll(xt, shift=(-d) % HW, axis=1)
                        xt = xt * mt
                    accs[n] = accs[n] + jnp.dot(
                        wt, xt, preferred_element_type=f32)  # (cout, HW)

        # BatchNorm (training semantics).  Channels are sublane rows, so the
        # per-channel reduction over (N, H, W) is a lane reduction done as an
        # MXU dot against a ones column.  Two-pass (centered) variance.
        s1 = None
        for n in range(N):
            p = jnp.dot(accs[n], ones_col, preferred_element_type=f32)
            s1 = p if s1 is None else s1 + p
        mean = s1 * inv_cnt                          # (cout, 1)

        yc = [a - mean for a in accs]                # centered, reused below
        s2 = None
        for n in range(N):
            p = jnp.dot(yc[n] * yc[n], ones_col, preferred_element_type=f32)
            s2 = p if s2 is None else s2 + p
        var = s2 * inv_cnt                           # biased, like BN train

        scale = g_ref[...] * jax.lax.rsqrt(var + eps)   # (cout, 1)
        shift = b_ref[...]
        return [jnp.maximum(y * scale + shift, 0.0) for y in yc]   # ReLU

    # Layer 1 -> layer 2; the intermediate stays lane-dense on-chip.
    xs = [x_ref[n].astype(f32) for n in range(N)]
    y1 = conv_bn_relu(xs, w1_ref, g1_ref, b1_ref)
    y2 = conv_bn_relu(y1, w2_ref, g2_ref, b2_ref)

    # Lane-dense store: (N*Cout, H*W), 256 full lanes -> unmasked vst.
    cout = w2_ref.shape[1]
    for n in range(N):
        o_ref[n * cout:(n + 1) * cout, :] = y2[n].astype(o_ref.dtype)


def _make_tap_masks(H, W):
    """(9, 1, H*W) float 0/1 masks: validity of each conv tap per output lane."""
    hw = H * W
    lane = jnp.arange(hw, dtype=jnp.int32)
    h_idx = lane // W
    w_idx = lane % W
    rows = []
    for dh in (-1, 0, 1):
        for dw in (-1, 0, 1):
            ok = ((h_idx + dh >= 0) & (h_idx + dh < H) &
                  (w_idx + dw >= 0) & (w_idx + dw < W))
            rows.append(ok.astype(jnp.float32))
    return jnp.stack(rows, axis=0).reshape(9, 1, hw)


def conv_cat_forward(x_nchw, params, eps=1e-5):
    """ConvCat.forward.  x_nchw: (N, Cin, H, W) like PyTorch; returns NCHW."""
    w1, g1, b1, w2, g2, b2 = params
    N, Cin, H, W = x_nchw.shape
    Cout = w1.shape[1]
    HW = H * W

    x2d = x_nchw.reshape(N, Cin, HW)       # free row-major reshape, no kernel
    masks = _make_tap_masks(H, W)          # constants under jit

    out2d = pl.pallas_call(
        functools.partial(_conv_cat_kernel, eps=eps, img_w=W),
        out_shape=jax.ShapeDtypeStruct((N * Cout, HW), x_nchw.dtype),
        grid=(1,),  # whole (tiny) problem in one VMEM-resident block
        in_specs=[
            pl.BlockSpec((9, 1, HW), lambda i: (0, 0, 0)),       # tap masks
            pl.BlockSpec((N, Cin, HW), lambda i: (0, 0, 0)),     # x
            pl.BlockSpec((9, Cout, Cin), lambda i: (0, 0, 0)),   # w1
            pl.BlockSpec((Cout, 1), lambda i: (0, 0)),           # g1
            pl.BlockSpec((Cout, 1), lambda i: (0, 0)),           # b1
            pl.BlockSpec((9, Cout, Cout), lambda i: (0, 0, 0)),  # w2
            pl.BlockSpec((Cout, 1), lambda i: (0, 0)),           # g2
            pl.BlockSpec((Cout, 1), lambda i: (0, 0)),           # b2
        ],
        out_specs=pl.BlockSpec((N * Cout, HW), lambda i: (0, 0)),
        compiler_params=pltpu.CompilerParams(
            dimension_semantics=("arbitrary",)),
    )(masks, x2d, w1, g1, b1, w2, g2, b2)

    return out2d.reshape(N, Cout, H, W)    # free reshape -> NCHW, no transpose


def init_params(key, in_channels, out_channels):
    """Deterministic synthetic init; conv weights stored tap-major (9,Cout,Cin)."""
    k1, k2 = jax.random.split(key, 2)

    def conv_w(k, cin, cout):
        fan = cin * 9
        w_hwio = (jax.random.normal(k, (3, 3, cin, cout), jnp.float32)
                  * (2.0 / fan) ** 0.5)
        return jnp.transpose(w_hwio, (0, 1, 3, 2)).reshape(9, cout, cin)

    w1 = conv_w(k1, in_channels, out_channels)
    w2 = conv_w(k2, out_channels, out_channels)
    g1 = jnp.ones((out_channels, 1), jnp.float32)    # BN default: weight = 1
    b1 = jnp.zeros((out_channels, 1), jnp.float32)   #             bias   = 0
    g2 = jnp.ones((out_channels, 1), jnp.float32)
    b2 = jnp.zeros((out_channels, 1), jnp.float32)
    return (w1, g1, b1, w2, g2, b2)


def _reference_forward(x_nchw, params, eps=1e-5):
    """Pure-JAX reference (XLA conv + training-mode BN + ReLU), for checking."""
    w1, g1, b1, w2, g2, b2 = params
    x = jnp.transpose(x_nchw, (0, 2, 3, 1))          # NCHW -> NHWC

    def layer(x, w_taps, g, b):
        cout, cin = w_taps.shape[1], w_taps.shape[2]
        w_hwio = jnp.transpose(w_taps.reshape(3, 3, cout, cin), (0, 1, 3, 2))
        y = jax.lax.conv_general_dilated(
            x, w_hwio, window_strides=(1, 1), padding="SAME",
            dimension_numbers=("NHWC", "HWIO", "NHWC"),
            precision=jax.lax.Precision.HIGHEST)
        mean = jnp.mean(y, axis=(0, 1, 2))
        var = jnp.var(y, axis=(0, 1, 2))             # biased, like BN train
        y = (y - mean) * jax.lax.rsqrt(var + eps) * g.reshape(-1) + b.reshape(-1)
        return jnp.maximum(y, 0.0)

    y = layer(x, w1, g1, b1)
    y = layer(y, w2, g2, b2)
    return jnp.transpose(y, (0, 3, 1, 2))            # NHWC -> NCHW


if __name__ == "__main__":
    N, Cin, Cout, H, W = 2, 4, 8, 16, 16

    key = jax.random.PRNGKey(0)
    kx, kp = jax.random.split(key)
    x = jax.random.normal(kx, (N, Cin, H, W), jnp.float32)   # NCHW like PyTorch
    params = init_params(kp, Cin, Cout)

    fwd = jax.jit(conv_cat_forward)
    out = fwd(x, params)                                     # (N, Cout, H, W)
    jax.block_until_ready(out)
    assert out.shape == (N, Cout, H, W)

    ref = _reference_forward(x, params)
    jax.block_until_ready(ref)
    assert jnp.allclose(out, ref, atol=1e-3, rtol=1e-3), (
        float(jnp.max(jnp.abs(out - ref))))

    print("KERNEL_OK")
</pallas_src>

<mosaic_0001>
module attributes {stable_mosaic.version = 11 : i64} {
  func.func @_conv_cat_kernel(%arg0: i32, %arg1: memref<9x1x256xf32, #tpu.memory_space<vmem>>, %arg2: memref<2x4x256xf32, #tpu.memory_space<vmem>>, %arg3: memref<9x8x4xf32, #tpu.memory_space<vmem>>, %arg4: memref<8x1xf32, #tpu.memory_space<vmem>>, %arg5: memref<8x1xf32, #tpu.memory_space<vmem>>, %arg6: memref<9x8x8xf32, #tpu.memory_space<vmem>>, %arg7: memref<8x1xf32, #tpu.memory_space<vmem>>, %arg8: memref<8x1xf32, #tpu.memory_space<vmem>>, %arg9: memref<16x256xf32, #tpu.memory_space<vmem>>) attributes {dimension_semantics = [#tpu.dimension_semantics<arbitrary>], iteration_bounds = array<i64: 1>, scalar_prefetch = 0 : i64, scratch_operands = 0 : i64, tpu.core_type = #tpu.core_type<tc>, window_params = [{pipeline_mode = #tpu.pipeline_mode<synchronous>, transform_indices = @transform_0, window_bounds = array<i64: 9, 1, 256>}, {pipeline_mode = #tpu.pipeline_mode<synchronous>, transform_indices = @transform_1, window_bounds = array<i64: 2, 4, 256>}, {pipeline_mode = #tpu.pipeline_mode<synchronous>, transform_indices = @transform_2, window_bounds = array<i64: 9, 8, 4>}, {pipeline_mode = #tpu.pipeline_mode<synchronous>, transform_indices = @transform_3, window_bounds = array<i64: 8, 1>}, {pipeline_mode = #tpu.pipeline_mode<synchronous>, transform_indices = @transform_4, window_bounds = array<i64: 8, 1>}, {pipeline_mode = #tpu.pipeline_mode<synchronous>, transform_indices = @transform_5, window_bounds = array<i64: 9, 8, 8>}, {pipeline_mode = #tpu.pipeline_mode<synchronous>, transform_indices = @transform_6, window_bounds = array<i64: 8, 1>}, {pipeline_mode = #tpu.pipeline_mode<synchronous>, transform_indices = @transform_7, window_bounds = array<i64: 8, 1>}, {pipeline_mode = #tpu.pipeline_mode<synchronous>, transform_indices = @transform_8, window_bounds = array<i64: 16, 256>}]} {
    %cst = arith.constant 1.000000e+00 : f32
    %0 = vector.broadcast %cst : f32 to vector<256x1xf32>
    %c0 = arith.constant 0 : index
    %c0_0 = arith.constant 0 : index
    %c0_1 = arith.constant 0 : index
    %1 = vector.load %arg2[%c0, %c0_0, %c0_1] : memref<2x4x256xf32, #tpu.memory_space<vmem>>, vector<1x4x256xf32>
    %2 = vector.shape_cast %1 : vector<1x4x256xf32> to vector<4x256xf32>
    %c1 = arith.constant 1 : index
    %c0_2 = arith.constant 0 : index
    %c0_3 = arith.constant 0 : index
    %3 = vector.load %arg2[%c1, %c0_2, %c0_3] : memref<2x4x256xf32, #tpu.memory_space<vmem>>, vector<1x4x256xf32>
    %4 = vector.shape_cast %3 : vector<1x4x256xf32> to vector<4x256xf32>
    %cst_4 = arith.constant 0.000000e+00 : f32
    %5 = vector.broadcast %cst_4 : f32 to vector<8x256xf32>
    %cst_5 = arith.constant 0.000000e+00 : f32
    %6 = vector.broadcast %cst_5 : f32 to vector<8x256xf32>
    %c0_6 = arith.constant 0 : index
    %c0_7 = arith.constant 0 : index
    %c0_8 = arith.constant 0 : index
    %7 = vector.load %arg3[%c0_6, %c0_7, %c0_8] : memref<9x8x4xf32, #tpu.memory_space<vmem>>, vector<1x8x4xf32>
    %8 = vector.shape_cast %7 : vector<1x8x4xf32> to vector<8x4xf32>
    %c0_9 = arith.constant 0 : index
    %c0_10 = arith.constant 0 : index
    %c0_11 = arith.constant 0 : index
    %9 = vector.load %arg1[%c0_9, %c0_10, %c0_11] : memref<9x1x256xf32, #tpu.memory_space<vmem>>, vector<1x1x256xf32>
    %10 = vector.shape_cast %9 : vector<1x1x256xf32> to vector<1x256xf32>
    %c17_i32 = arith.constant 17 : i32
    %11 = tpu.dynamic_rotate %2 by %c17_i32 dim 1 : vector<4x256xf32>, i32 -> vector<4x256xf32>
    %12 = vector.broadcast %10 : vector<1x256xf32> to vector<4x256xf32>
    %13 = arith.mulf %11, %12 : vector<4x256xf32>
    %cst_12 = arith.constant dense<0.000000e+00> : vector<8x256xf32>
    %14 = tpu.matmul %8, %13, %cst_12 {dimension_numbers = #tpu.dot_dimension_numbers<[1], [0], [0], [1], [0, 0, 1, 1], [], []>} : vector<8x4xf32>, vector<4x256xf32>, vector<8x256xf32> -> vector<8x256xf32>
    %15 = arith.addf %5, %14 : vector<8x256xf32>
    %c17_i32_13 = arith.constant 17 : i32
    %16 = tpu.dynamic_rotate %4 by %c17_i32_13 dim 1 : vector<4x256xf32>, i32 -> vector<4x256xf32>
    %17 = vector.broadcast %10 : vector<1x256xf32> to vector<4x256xf32>
    %18 = arith.mulf %16, %17 : vector<4x256xf32>
    %cst_14 = arith.constant dense<0.000000e+00> : vector<8x256xf32>
    %19 = tpu.matmul %8, %18, %cst_14 {dimension_numbers = #tpu.dot_dimension_numbers<[1], [0], [0], [1], [0, 0, 1, 1], [], []>} : vector<8x4xf32>, vector<4x256xf32>, vector<8x256xf32> -> vector<8x256xf32>
    %20 = arith.addf %6, %19 : vector<8x256xf32>
    %c1_15 = arith.constant 1 : index
    %c0_16 = arith.constant 0 : index
    %c0_17 = arith.constant 0 : index
    %21 = vector.load %arg3[%c1_15, %c0_16, %c0_17] : memref<9x8x4xf32, #tpu.memory_space<vmem>>, vector<1x8x4xf32>
    %22 = vector.shape_cast %21 : vector<1x8x4xf32> to vector<8x4xf32>
    %c1_18 = arith.constant 1 : index
    %c0_19 = arith.constant 0 : index
    %c0_20 = arith.constant 0 : index
    %23 = vector.load %arg1[%c1_18, %c0_19, %c0_20] : memref<9x1x256xf32, #tpu.memory_space<vmem>>, vector<1x1x256xf32>
    %24 = vector.shape_cast %23 : vector<1x1x256xf32> to vector<1x256xf32>
    %c16_i32 = arith.constant 16 : i32
    %25 = tpu.dynamic_rotate %2 by %c16_i32 dim 1 : vector<4x256xf32>, i32 -> vector<4x256xf32>
    %26 = vector.broadcast %24 : vector<1x256xf32> to vector<4x256xf32>
    %27 = arith.mulf %25, %26 : vector<4x256xf32>
    %cst_21 = arith.constant dense<0.000000e+00> : vector<8x256xf32>
    %28 = tpu.matmul %22, %27, %cst_21 {dimension_numbers = #tpu.dot_dimension_numbers<[1], [0], [0], [1], [0, 0, 1, 1], [], []>} : vector<8x4xf32>, vector<4x256xf32>, vector<8x256xf32> -> vector<8x256xf32>
    %29 = arith.addf %15, %28 : vector<8x256xf32>
    %c16_i32_22 = arith.constant 16 : i32
    %30 = tpu.dynamic_rotate %4 by %c16_i32_22 dim 1 : vector<4x256xf32>, i32 -> vector<4x256xf32>
    %31 = vector.broadcast %24 : vector<1x256xf32> to vector<4x256xf32>
    %32 = arith.mulf %30, %31 : vector<4x256xf32>
    %cst_23 = arith.constant dense<0.000000e+00> : vector<8x256xf32>
    %33 = tpu.matmul %22, %32, %cst_23 {dimension_numbers = #tpu.dot_dimension_numbers<[1], [0], [0], [1], [0, 0, 1, 1], [], []>} : vector<8x4xf32>, vector<4x256xf32>, vector<8x256xf32> -> vector<8x256xf32>
    %34 = arith.addf %20, %33 : vector<8x256xf32>
    %c2 = arith.constant 2 : index
    %c0_24 = arith.constant 0 : index
    %c0_25 = arith.constant 0 : index
    %35 = vector.load %arg3[%c2, %c0_24, %c0_25] : memref<9x8x4xf32, #tpu.memory_space<vmem>>, vector<1x8x4xf32>
    %36 = vector.shape_cast %35 : vector<1x8x4xf32> to vector<8x4xf32>
    %c2_26 = arith.constant 2 : index
    %c0_27 = arith.constant 0 : index
    %c0_28 = arith.constant 0 : index
    %37 = vector.load %arg1[%c2_26, %c0_27, %c0_28] : memref<9x1x256xf32, #tpu.memory_space<vmem>>, vector<1x1x256xf32>
    %38 = vector.shape_cast %37 : vector<1x1x256xf32> to vector<1x256xf32>
    %c15_i32 = arith.constant 15 : i32
    %39 = tpu.dynamic_rotate %2 by %c15_i32 dim 1 : vector<4x256xf32>, i32 -> vector<4x256xf32>
    %40 = vector.broadcast %38 : vector<1x256xf32> to vector<4x256xf32>
    %41 = arith.mulf %39, %40 : vector<4x256xf32>
    %cst_29 = arith.constant dense<0.000000e+00> : vector<8x256xf32>
    %42 = tpu.matmul %36, %41, %cst_29 {dimension_numbers = #tpu.dot_dimension_numbers<[1], [0], [0], [1], [0, 0, 1, 1], [], []>} : vector<8x4xf32>, vector<4x256xf32>, vector<8x256xf32> -> vector<8x256xf32>
    %43 = arith.addf %29, %42 : vector<8x256xf32>
    %c15_i32_30 = arith.constant 15 : i32
    %44 = tpu.dynamic_rotate %4 by %c15_i32_30 dim 1 : vector<4x256xf32>, i32 -> vector<4x256xf32>
    %45 = vector.broadcast %38 : vector<1x256xf32> to vector<4x256xf32>
    %46 = arith.mulf %44, %45 : vector<4x256xf32>
    %cst_31 = arith.constant dense<0.000000e+00> : vector<8x256xf32>
    %47 = tpu.matmul %36, %46, %cst_31 {dimension_numbers = #tpu.dot_dimension_numbers<[1], [0], [0], [1], [0, 0, 1, 1], [], []>} : vector<8x4xf32>, vector<4x256xf32>, vector<8x256xf32> -> vector<8x256xf32>
    %48 = arith.addf %34, %47 : vector<8x256xf32>
    %c3 = arith.constant 3 : index
    %c0_32 = arith.constant 0 : index
    %c0_33 = arith.constant 0 : index
    %49 = vector.load %arg3[%c3, %c0_32, %c0_33] : memref<9x8x4xf32, #tpu.memory_space<vmem>>, vector<1x8x4xf32>
    %50 = vector.shape_cast %49 : vector<1x8x4xf32> to vector<8x4xf32>
    %c3_34 = arith.constant 3 : index
    %c0_35 = arith.constant 0 : index
    %c0_36 = arith.constant 0 : index
    %51 = vector.load %arg1[%c3_34, %c0_35, %c0_36] : memref<9x1x256xf32, #tpu.memory_space<vmem>>, vector<1x1x256xf32>
    %52 = vector.shape_cast %51 : vector<1x1x256xf32> to vector<1x256xf32>
    %c1_i32 = arith.constant 1 : i32
    %53 = tpu.dynamic_rotate %2 by %c1_i32 dim 1 : vector<4x256xf32>, i32 -> vector<4x256xf32>
    %54 = vector.broadcast %52 : vector<1x256xf32> to vector<4x256xf32>
    %55 = arith.mulf %53, %54 : vector<4x256xf32>
    %cst_37 = arith.constant dense<0.000000e+00> : vector<8x256xf32>
    %56 = tpu.matmul %50, %55, %cst_37 {dimension_numbers = #tpu.dot_dimension_numbers<[1], [0], [0], [1], [0, 0, 1, 1], [], []>} : vector<8x4xf32>, vector<4x256xf32>, vector<8x256xf32> -> vector<8x256xf32>
    %57 = arith.addf %43, %56 : vector<8x256xf32>
    %c1_i32_38 = arith.constant 1 : i32
    %58 = tpu.dynamic_rotate %4 by %c1_i32_38 dim 1 : vector<4x256xf32>, i32 -> vector<4x256xf32>
    %59 = vector.broadcast %52 : vector<1x256xf32> to vector<4x256xf32>
    %60 = arith.mulf %58, %59 : vector<4x256xf32>
    %cst_39 = arith.constant dense<0.000000e+00> : vector<8x256xf32>
    %61 = tpu.matmul %50, %60, %cst_39 {dimension_numbers = #tpu.dot_dimension_numbers<[1], [0], [0], [1], [0, 0, 1, 1], [], []>} : vector<8x4xf32>, vector<4x256xf32>, vector<8x256xf32> -> vector<8x256xf32>
    %62 = arith.addf %48, %61 : vector<8x256xf32>
    %c4 = arith.constant 4 : index
    %c0_40 = arith.constant 0 : index
    %c0_41 = arith.constant 0 : index
    %63 = vector.load %arg3[%c4, %c0_40, %c0_41] : memref<9x8x4xf32, #tpu.memory_space<vmem>>, vector<1x8x4xf32>
    %64 = vector.shape_cast %63 : vector<1x8x4xf32> to vector<8x4xf32>
    %cst_42 = arith.constant dense<0.000000e+00> : vector<8x256xf32>
    %65 = tpu.matmul %64, %2, %cst_42 {dimension_numbers = #tpu.dot_dimension_numbers<[1], [0], [0], [1], [0, 0, 1, 1], [], []>} : vector<8x4xf32>, vector<4x256xf32>, vector<8x256xf32> -> vector<8x256xf32>
    %66 = arith.addf %57, %65 : vector<8x256xf32>
    %cst_43 = arith.constant dense<0.000000e+00> : vector<8x256xf32>
    %67 = tpu.matmul %64, %4, %cst_43 {dimension_numbers = #tpu.dot_dimension_numbers<[1], [0], [0], [1], [0, 0, 1, 1], [], []>} : vector<8x4xf32>, vector<4x256xf32>, vector<8x256xf32> -> vector<8x256xf32>
    %68 = arith.addf %62, %67 : vector<8x256xf32>
    %c5 = arith.constant 5 : index
    %c0_44 = arith.constant 0 : index
    %c0_45 = arith.constant 0 : index
    %69 = vector.load %arg3[%c5, %c0_44, %c0_45] : memref<9x8x4xf32, #tpu.memory_space<vmem>>, vector<1x8x4xf32>
    %70 = vector.shape_cast %69 : vector<1x8x4xf32> to vector<8x4xf32>
    %c5_46 = arith.constant 5 : index
    %c0_47 = arith.constant 0 : index
    %c0_48 = arith.constant 0 : index
    %71 = vector.load %arg1[%c5_46, %c0_47, %c0_48] : memref<9x1x256xf32, #tpu.memory_space<vmem>>, vector<1x1x256xf32>
    %72 = vector.shape_cast %71 : vector<1x1x256xf32> to vector<1x256xf32>
    %c255_i32 = arith.constant 255 : i32
    %73 = tpu.dynamic_rotate %2 by %c255_i32 dim 1 : vector<4x256xf32>, i32 -> vector<4x256xf32>
    %74 = vector.broadcast %72 : vector<1x256xf32> to vector<4x256xf32>
    %75 = arith.mulf %73, %74 : vector<4x256xf32>
    %cst_49 = arith.constant dense<0.000000e+00> : vector<8x256xf32>
    %76 = tpu.matmul %70, %75, %cst_49 {dimension_numbers = #tpu.dot_dimension_numbers<[1], [0], [0], [1], [0, 0, 1, 1], [], []>} : vector<8x4xf32>, vector<4x256xf32>, vector<8x256xf32> -> vector<8x256xf32>
    %77 = arith.addf %66, %76 : vector<8x256xf32>
    %c255_i32_50 = arith.constant 255 : i32
    %78 = tpu.dynamic_rotate %4 by %c255_i32_50 dim 1 : vector<4x256xf32>, i32 -> vector<4x256xf32>
    %79 = vector.broadcast %72 : vector<1x256xf32> to vector<4x256xf32>
    %80 = arith.mulf %78, %79 : vector<4x256xf32>
    %cst_51 = arith.constant dense<0.000000e+00> : vector<8x256xf32>
    %81 = tpu.matmul %70, %80, %cst_51 {dimension_numbers = #tpu.dot_dimension_numbers<[1], [0], [0], [1], [0, 0, 1, 1], [], []>} : vector<8x4xf32>, vector<4x256xf32>, vector<8x256xf32> -> vector<8x256xf32>
    %82 = arith.addf %68, %81 : vector<8x256xf32>
    %c6 = arith.constant 6 : index
    %c0_52 = arith.constant 0 : index
    %c0_53 = arith.constant 0 : index
    %83 = vector.load %arg3[%c6, %c0_52, %c0_53] : memref<9x8x4xf32, #tpu.memory_space<vmem>>, vector<1x8x4xf32>
    %84 = vector.shape_cast %83 : vector<1x8x4xf32> to vector<8x4xf32>
    %c6_54 = arith.constant 6 : index
    %c0_55 = arith.constant 0 : index
    %c0_56 = arith.constant 0 : index
    %85 = vector.load %arg1[%c6_54, %c0_55, %c0_56] : memref<9x1x256xf32, #tpu.memory_space<vmem>>, vector<1x1x256xf32>
    %86 = vector.shape_cast %85 : vector<1x1x256xf32> to vector<1x256xf32>
    %c241_i32 = arith.constant 241 : i32
    %87 = tpu.dynamic_rotate %2 by %c241_i32 dim 1 : vector<4x256xf32>, i32 -> vector<4x256xf32>
    %88 = vector.broadcast %86 : vector<1x256xf32> to vector<4x256xf32>
    %89 = arith.mulf %87, %88 : vector<4x256xf32>
    %cst_57 = arith.constant dense<0.000000e+00> : vector<8x256xf32>
    %90 = tpu.matmul %84, %89, %cst_57 {dimension_numbers = #tpu.dot_dimension_numbers<[1], [0], [0], [1], [0, 0, 1, 1], [], []>} : vector<8x4xf32>, vector<4x256xf32>, vector<8x256xf32> -> vector<8x256xf32>
    %91 = arith.addf %77, %90 : vector<8x256xf32>
    %c241_i32_58 = arith.constant 241 : i32
    %92 = tpu.dynamic_rotate %4 by %c241_i32_58 dim 1 : vector<4x256xf32>, i32 -> vector<4x256xf32>
    %93 = vector.broadcast %86 : vector<1x256xf32> to vector<4x256xf32>
    %94 = arith.mulf %92, %93 : vector<4x256xf32>
    %cst_59 = arith.constant dense<0.000000e+00> : vector<8x256xf32>
    %95 = tpu.matmul %84, %94, %cst_59 {dimension_numbers = #tpu.dot_dimension_numbers<[1], [0], [0], [1], [0, 0, 1, 1], [], []>} : vector<8x4xf32>, vector<4x256xf32>, vector<8x256xf32> -> vector<8x256xf32>
    %96 = arith.addf %82, %95 : vector<8x256xf32>
    %c7 = arith.constant 7 : index
    %c0_60 = arith.constant 0 : index
    %c0_61 = arith.constant 0 : index
    %97 = vector.load %arg3[%c7, %c0_60, %c0_61] : memref<9x8x4xf32, #tpu.memory_space<vmem>>, vector<1x8x4xf32>
    %98 = vector.shape_cast %97 : vector<1x8x4xf32> to vector<8x4xf32>
    %c7_62 = arith.constant 7 : index
    %c0_63 = arith.constant 0 : index
    %c0_64 = arith.constant 0 : index
    %99 = vector.load %arg1[%c7_62, %c0_63, %c0_64] : memref<9x1x256xf32, #tpu.memory_space<vmem>>, vector<1x1x256xf32>
    %100 = vector.shape_cast %99 : vector<1x1x256xf32> to vector<1x256xf32>
    %c240_i32 = arith.constant 240 : i32
    %101 = tpu.dynamic_rotate %2 by %c240_i32 dim 1 : vector<4x256xf32>, i32 -> vector<4x256xf32>
    %102 = vector.broadcast %100 : vector<1x256xf32> to vector<4x256xf32>
    %103 = arith.mulf %101, %102 : vector<4x256xf32>
    %cst_65 = arith.constant dense<0.000000e+00> : vector<8x256xf32>
    %104 = tpu.matmul %98, %103, %cst_65 {dimension_numbers = #tpu.dot_dimension_numbers<[1], [0], [0], [1], [0, 0, 1, 1], [], []>} : vector<8x4xf32>, vector<4x256xf32>, vector<8x256xf32> -> vector<8x256xf32>
    %105 = arith.addf %91, %104 : vector<8x256xf32>
    %c240_i32_66 = arith.constant 240 : i32
    %106 = tpu.dynamic_rotate %4 by %c240_i32_66 dim 1 : vector<4x256xf32>, i32 -> vector<4x256xf32>
    %107 = vector.broadcast %100 : vector<1x256xf32> to vector<4x256xf32>
    %108 = arith.mulf %106, %107 : vector<4x256xf32>
    %cst_67 = arith.constant dense<0.000000e+00> : vector<8x256xf32>
    %109 = tpu.matmul %98, %108, %cst_67 {dimension_numbers = #tpu.dot_dimension_numbers<[1], [0], [0], [1], [0, 0, 1, 1], [], []>} : vector<8x4xf32>, vector<4x256xf32>, vector<8x256xf32> -> vector<8x256xf32>
    %110 = arith.addf %96, %109 : vector<8x256xf32>
    %c8 = arith.constant 8 : index
    %c0_68 = arith.constant 0 : index
    %c0_69 = arith.constant 0 : index
    %111 = vector.load %arg3[%c8, %c0_68, %c0_69] : memref<9x8x4xf32, #tpu.memory_space<vmem>>, vector<1x8x4xf32>
    %112 = vector.shape_cast %111 : vector<1x8x4xf32> to vector<8x4xf32>
    %c8_70 = arith.constant 8 : index
    %c0_71 = arith.constant 0 : index
    %c0_72 = arith.constant 0 : index
    %113 = vector.load %arg1[%c8_70, %c0_71, %c0_72] : memref<9x1x256xf32, #tpu.memory_space<vmem>>, vector<1x1x256xf32>
    %114 = vector.shape_cast %113 : vector<1x1x256xf32> to vector<1x256xf32>
    %c239_i32 = arith.constant 239 : i32
    %115 = tpu.dynamic_rotate %2 by %c239_i32 dim 1 : vector<4x256xf32>, i32 -> vector<4x256xf32>
    %116 = vector.broadcast %114 : vector<1x256xf32> to vector<4x256xf32>
    %117 = arith.mulf %115, %116 : vector<4x256xf32>
    %cst_73 = arith.constant dense<0.000000e+00> : vector<8x256xf32>
    %118 = tpu.matmul %112, %117, %cst_73 {dimension_numbers = #tpu.dot_dimension_numbers<[1], [0], [0], [1], [0, 0, 1, 1], [], []>} : vector<8x4xf32>, vector<4x256xf32>, vector<8x256xf32> -> vector<8x256xf32>
    %119 = arith.addf %105, %118 : vector<8x256xf32>
    %c239_i32_74 = arith.constant 239 : i32
    %120 = tpu.dynamic_rotate %4 by %c239_i32_74 dim 1 : vector<4x256xf32>, i32 -> vector<4x256xf32>
    %121 = vector.broadcast %114 : vector<1x256xf32> to vector<4x256xf32>
    %122 = arith.mulf %120, %121 : vector<4x256xf32>
    %cst_75 = arith.constant dense<0.000000e+00> : vector<8x256xf32>
    %123 = tpu.matmul %112, %122, %cst_75 {dimension_numbers = #tpu.dot_dimension_numbers<[1], [0], [0], [1], [0, 0, 1, 1], [], []>} : vector<8x4xf32>, vector<4x256xf32>, vector<8x256xf32> -> vector<8x256xf32>
    %124 = arith.addf %110, %123 : vector<8x256xf32>
    %cst_76 = arith.constant dense<0.000000e+00> : vector<8x1xf32>
    %125 = tpu.matmul %119, %0, %cst_76 {dimension_numbers = #tpu.dot_dimension_numbers<[1], [0], [0], [1], [0, 0, 1, 1], [], []>} : vector<8x256xf32>, vector<256x1xf32>, vector<8x1xf32> -> vector<8x1xf32>
    %cst_77 = arith.constant dense<0.000000e+00> : vector<8x1xf32>
    %126 = tpu.matmul %124, %0, %cst_77 {dimension_numbers = #tpu.dot_dimension_numbers<[1], [0], [0], [1], [0, 0, 1, 1], [], []>} : vector<8x256xf32>, vector<256x1xf32>, vector<8x1xf32> -> vector<8x1xf32>
    %127 = arith.addf %125, %126 : vector<8x1xf32>
    %cst_78 = arith.constant 0.001953125 : f32
    %128 = vector.broadcast %cst_78 : f32 to vector<8x1xf32>
    %129 = arith.mulf %127, %128 : vector<8x1xf32>
    %130 = vector.broadcast %129 : vector<8x1xf32> to vector<8x256xf32>
    %131 = arith.subf %119, %130 : vector<8x256xf32>
    %132 = vector.broadcast %129 : vector<8x1xf32> to vector<8x256xf32>
    %133 = arith.subf %124, %132 : vector<8x256xf32>
    %134 = arith.mulf %131, %131 : vector<8x256xf32>
    %cst_79 = arith.constant dense<0.000000e+00> : vector<8x1xf32>
    %135 = tpu.matmul %134, %0, %cst_79 {dimension_numbers = #tpu.dot_dimension_numbers<[1], [0], [0], [1], [0, 0, 1, 1], [], []>} : vector<8x256xf32>, vector<256x1xf32>, vector<8x1xf32> -> vector<8x1xf32>
    %136 = arith.mulf %133, %133 : vector<8x256xf32>
    %cst_80 = arith.constant dense<0.000000e+00> : vector<8x1xf32>
    %137 = tpu.matmul %136, %0, %cst_80 {dimension_numbers = #tpu.dot_dimension_numbers<[1], [0], [0], [1], [0, 0, 1, 1], [], []>} : vector<8x256xf32>, vector<256x1xf32>, vector<8x1xf32> -> vector<8x1xf32>
    %138 = arith.addf %135, %137 : vector<8x1xf32>
    %cst_81 = arith.constant 0.001953125 : f32
    %139 = vector.broadcast %cst_81 : f32 to vector<8x1xf32>
    %140 = arith.mulf %138, %139 : vector<8x1xf32>
    %c0_82 = arith.constant 0 : index
    %c0_83 = arith.constant 0 : index
    %141 = vector.load %arg4[%c0_82, %c0_83] : memref<8x1xf32, #tpu.memory_space<vmem>>, vector<8x1xf32>
    %cst_84 = arith.constant 9.99999974E-6 : f32
    %142 = vector.broadcast %cst_84 : f32 to vector<8x1xf32>
    %143 = arith.addf %140, %142 : vector<8x1xf32>
    %144 = math.rsqrt %143 : vector<8x1xf32>
    %145 = arith.mulf %141, %144 : vector<8x1xf32>
    %c0_85 = arith.constant 0 : index
    %c0_86 = arith.constant 0 : index
    %146 = vector.load %arg5[%c0_85, %c0_86] : memref<8x1xf32, #tpu.memory_space<vmem>>, vector<8x1xf32>
    %147 = vector.broadcast %145 : vector<8x1xf32> to vector<8x256xf32>
    %148 = arith.mulf %131, %147 : vector<8x256xf32>
    %149 = vector.broadcast %146 : vector<8x1xf32> to vector<8x256xf32>
    %150 = arith.addf %148, %149 : vector<8x256xf32>
    %cst_87 = arith.constant 0.000000e+00 : f32
    %151 = vector.broadcast %cst_87 : f32 to vector<8x256xf32>
    %152 = arith.maximumf %150, %151 : vector<8x256xf32>
    %153 = vector.broadcast %145 : vector<8x1xf32> to vector<8x256xf32>
    %154 = arith.mulf %133, %153 : vector<8x256xf32>
    %155 = vector.broadcast %146 : vector<8x1xf32> to vector<8x256xf32>
    %156 = arith.addf %154, %155 : vector<8x256xf32>
    %cst_88 = arith.constant 0.000000e+00 : f32
    %157 = vector.broadcast %cst_88 : f32 to vector<8x256xf32>
    %158 = arith.maximumf %156, %157 : vector<8x256xf32>
    %cst_89 = arith.constant 0.000000e+00 : f32
    %159 = vector.broadcast %cst_89 : f32 to vector<8x256xf32>
    %cst_90 = arith.constant 0.000000e+00 : f32
    %160 = vector.broadcast %cst_90 : f32 to vector<8x256xf32>
    %c0_91 = arith.constant 0 : index
    %c0_92 = arith.constant 0 : index
    %c0_93 = arith.constant 0 : index
    %161 = vector.load %arg6[%c0_91, %c0_92, %c0_93] : memref<9x8x8xf32, #tpu.memory_space<vmem>>, vector<1x8x8xf32>
    %162 = vector.shape_cast %161 : vector<1x8x8xf32> to vector<8x8xf32>
    %c0_94 = arith.constant 0 : index
    %c0_95 = arith.constant 0 : index
    %c0_96 = arith.constant 0 : index
    %163 = vector.load %arg1[%c0_94, %c0_95, %c0_96] : memref<9x1x256xf32, #tpu.memory_space<vmem>>, vector<1x1x256xf32>
    %164 = vector.shape_cast %163 : vector<1x1x256xf32> to vector<1x256xf32>
    %c17_i32_97 = arith.constant 17 : i32
    %165 = tpu.dynamic_rotate %152 by %c17_i32_97 dim 1 : vector<8x256xf32>, i32 -> vector<8x256xf32>
    %166 = vector.broadcast %164 : vector<1x256xf32> to vector<8x256xf32>
    %167 = arith.mulf %165, %166 : vector<8x256xf32>
    %cst_98 = arith.constant dense<0.000000e+00> : vector<8x256xf32>
    %168 = tpu.matmul %162, %167, %cst_98 {dimension_numbers = #tpu.dot_dimension_numbers<[1], [0], [0], [1], [0, 0, 1, 1], [], []>} : vector<8x8xf32>, vector<8x256xf32>, vector<8x256xf32> -> vector<8x256xf32>
    %169 = arith.addf %159, %168 : vector<8x256xf32>
    %c17_i32_99 = arith.constant 17 : i32
    %170 = tpu.dynamic_rotate %158 by %c17_i32_99 dim 1 : vector<8x256xf32>, i32 -> vector<8x256xf32>
    %171 = vector.broadcast %164 : vector<1x256xf32> to vector<8x256xf32>
    %172 = arith.mulf %170, %171 : vector<8x256xf32>
    %cst_100 = arith.constant dense<0.000000e+00> : vector<8x256xf32>
    %173 = tpu.matmul %162, %172, %cst_100 {dimension_numbers = #tpu.dot_dimension_numbers<[1], [0], [0], [1], [0, 0, 1, 1], [], []>} : vector<8x8xf32>, vector<8x256xf32>, vector<8x256xf32> -> vector<8x256xf32>
    %174 = arith.addf %160, %173 : vector<8x256xf32>
    %c1_101 = arith.constant 1 : index
    %c0_102 = arith.constant 0 : index
    %c0_103 = arith.constant 0 : index
    %175 = vector.load %arg6[%c1_101, %c0_102, %c0_103] : memref<9x8x8xf32, #tpu.memory_space<vmem>>, vector<1x8x8xf32>
    %176 = vector.shape_cast %175 : vector<1x8x8xf32> to vector<8x8xf32>
    %c1_104 = arith.constant 1 : index
    %c0_105 = arith.constant 0 : index
    %c0_106 = arith.constant 0 : index
    %177 = vector.load %arg1[%c1_104, %c0_105, %c0_106] : memref<9x1x256xf32, #tpu.memory_space<vmem>>, vector<1x1x256xf32>
    %178 = vector.shape_cast %177 : vector<1x1x256xf32> to vector<1x256xf32>
    %c16_i32_107 = arith.constant 16 : i32
    %179 = tpu.dynamic_rotate %152 by %c16_i32_107 dim 1 : vector<8x256xf32>, i32 -> vector<8x256xf32>
    %180 = vector.broadcast %178 : vector<1x256xf32> to vector<8x256xf32>
    %181 = arith.mulf %179, %180 : vector<8x256xf32>
    %cst_108 = arith.constant dense<0.000000e+00> : vector<8x256xf32>
    %182 = tpu.matmul %176, %181, %cst_108 {dimension_numbers = #tpu.dot_dimension_numbers<[1], [0], [0], [1], [0, 0, 1, 1], [], []>} : vector<8x8xf32>, vector<8x256xf32>, vector<8x256xf32> -> vector<8x256xf32>
    %183 = arith.addf %169, %182 : vector<8x256xf32>
    %c16_i32_109 = arith.constant 16 : i32
    %184 = tpu.dynamic_rotate %158 by %c16_i32_109 dim 1 : vector<8x256xf32>, i32 -> vector<8x256xf32>
    %185 = vector.broadcast %178 : vector<1x256xf32> to vector<8x256xf32>
    %186 = arith.mulf %184, %185 : vector<8x256xf32>
    %cst_110 = arith.constant dense<0.000000e+00> : vector<8x256xf32>
    %187 = tpu.matmul %176, %186, %cst_110 {dimension_numbers = #tpu.dot_dimension_numbers<[1], [0], [0], [1], [0, 0, 1, 1], [], []>} : vector<8x8xf32>, vector<8x256xf32>, vector<8x256xf32> -> vector<8x256xf32>
    %188 = arith.addf %174, %187 : vector<8x256xf32>
    %c2_111 = arith.constant 2 : index
    %c0_112 = arith.constant 0 : index
    %c0_113 = arith.constant 0 : index
    %189 = vector.load %arg6[%c2_111, %c0_112, %c0_113] : memref<9x8x8xf32, #tpu.memory_space<vmem>>, vector<1x8x8xf32>
    %190 = vector.shape_cast %189 : vector<1x8x8xf32> to vector<8x8xf32>
    %c2_114 = arith.constant 2 : index
    %c0_115 = arith.constant 0 : index
    %c0_116 = arith.constant 0 : index
    %191 = vector.load %arg1[%c2_114, %c0_115, %c0_116] : memref<9x1x256xf32, #tpu.memory_space<vmem>>, vector<1x1x256xf32>
    %192 = vector.shape_cast %191 : vector<1x1x256xf32> to vector<1x256xf32>
    %c15_i32_117 = arith.constant 15 : i32
    %193 = tpu.dynamic_rotate %152 by %c15_i32_117 dim 1 : vector<8x256xf32>, i32 -> vector<8x256xf32>
    %194 = vector.broadcast %192 : vector<1x256xf32> to vector<8x256xf32>
    %195 = arith.mulf %193, %194 : vector<8x256xf32>
    %cst_118 = arith.constant dense<0.000000e+00> : vector<8x256xf32>
    %196 = tpu.matmul %190, %195, %cst_118 {dimension_numbers = #tpu.dot_dimension_numbers<[1], [0], [0], [1], [0, 0, 1, 1], [], []>} : vector<8x8xf32>, vector<8x256xf32>, vector<8x256xf32> -> vector<8x256xf32>
    %197 = arith.addf %183, %196 : vector<8x256xf32>
    %c15_i32_119 = arith.constant 15 : i32
    %198 = tpu.dynamic_rotate %158 by %c15_i32_119 dim 1 : vector<8x256xf32>, i32 -> vector<8x256xf32>
    %199 = vector.broadcast %192 : vector<1x256xf32> to vector<8x256xf32>
    %200 = arith.mulf %198, %199 : vector<8x256xf32>
    %cst_120 = arith.constant dense<0.000000e+00> : vector<8x256xf32>
    %201 = tpu.matmul %190, %200, %cst_120 {dimension_numbers = #tpu.dot_dimension_numbers<[1], [0], [0], [1], [0, 0, 1, 1], [], []>} : vector<8x8xf32>, vector<8x256xf32>, vector<8x256xf32> -> vector<8x256xf32>
    %202 = arith.addf %188, %201 : vector<8x256xf32>
    %c3_121 = arith.constant 3 : index
    %c0_122 = arith.constant 0 : index
    %c0_123 = arith.constant 0 : index
    %203 = vector.load %arg6[%c3_121, %c0_122, %c0_123] : memref<9x8x8xf32, #tpu.memory_space<vmem>>, vector<1x8x8xf32>
    %204 = vector.shape_cast %203 : vector<1x8x8xf32> to vector<8x8xf32>
    %c3_124 = arith.constant 3 : index
    %c0_125 = arith.constant 0 : index
    %c0_126 = arith.constant 0 : index
    %205 = vector.load %arg1[%c3_124, %c0_125, %c0_126] : memref<9x1x256xf32, #tpu.memory_space<vmem>>, vector<1x1x256xf32>
    %206 = vector.shape_cast %205 : vector<1x1x256xf32> to vector<1x256xf32>
    %c1_i32_127 = arith.constant 1 : i32
    %207 = tpu.dynamic_rotate %152 by %c1_i32_127 dim 1 : vector<8x256xf32>, i32 -> vector<8x256xf32>
    %208 = vector.broadcast %206 : vector<1x256xf32> to vector<8x256xf32>
    %209 = arith.mulf %207, %208 : vector<8x256xf32>
    %cst_128 = arith.constant dense<0.000000e+00> : vector<8x256xf32>
    %210 = tpu.matmul %204, %209, %cst_128 {dimension_numbers = #tpu.dot_dimension_numbers<[1], [0], [0], [1], [0, 0, 1, 1], [], []>} : vector<8x8xf32>, vector<8x256xf32>, vector<8x256xf32> -> vector<8x256xf32>
    %211 = arith.addf %197, %210 : vector<8x256xf32>
    %c1_i32_129 = arith.constant 1 : i32
    %212 = tpu.dynamic_rotate %158 by %c1_i32_129 dim 1 : vector<8x256xf32>, i32 -> vector<8x256xf32>
    %213 = vector.broadcast %206 : vector<1x256xf32> to vector<8x256xf32>
    %214 = arith.mulf %212, %213 : vector<8x256xf32>
    %cst_130 = arith.constant dense<0.000000e+00> : vector<8x256xf32>
    %215 = tpu.matmul %204, %214, %cst_130 {dimension_numbers = #tpu.dot_dimension_numbers<[1], [0], [0], [1], [0, 0, 1, 1], [], []>} : vector<8x8xf32>, vector<8x256xf32>, vector<8x256xf32> -> vector<8x256xf32>
    %216 = arith.addf %202, %215 : vector<8x256xf32>
    %c4_131 = arith.constant 4 : index
    %c0_132 = arith.constant 0 : index
    %c0_133 = arith.constant 0 : index
    %217 = vector.load %arg6[%c4_131, %c0_132, %c0_133] : memref<9x8x8xf32, #tpu.memory_space<vmem>>, vector<1x8x8xf32>
    %218 = vector.shape_cast %217 : vector<1x8x8xf32> to vector<8x8xf32>
    %cst_134 = arith.constant dense<0.000000e+00> : vector<8x256xf32>
    %219 = tpu.matmul %218, %152, %cst_134 {dimension_numbers = #tpu.dot_dimension_numbers<[1], [0], [0], [1], [0, 0, 1, 1], [], []>} : vector<8x8xf32>, vector<8x256xf32>, vector<8x256xf32> -> vector<8x256xf32>
    %220 = arith.addf %211, %219 : vector<8x256xf32>
    %cst_135 = arith.constant dense<0.000000e+00> : vector<8x256xf32>
    %221 = tpu.matmul %218, %158, %cst_135 {dimension_numbers = #tpu.dot_dimension_numbers<[1], [0], [0], [1], [0, 0, 1, 1], [], []>} : vector<8x8xf32>, vector<8x256xf32>, vector<8x256xf32> -> vector<8x256xf32>
    %222 = arith.addf %216, %221 : vector<8x256xf32>
    %c5_136 = arith.constant 5 : index
    %c0_137 = arith.constant 0 : index
    %c0_138 = arith.constant 0 : index
    %223 = vector.load %arg6[%c5_136, %c0_137, %c0_138] : memref<9x8x8xf32, #tpu.memory_space<vmem>>, vector<1x8x8xf32>
    %224 = vector.shape_cast %223 : vector<1x8x8xf32> to vector<8x8xf32>
    %c5_139 = arith.constant 5 : index
    %c0_140 = arith.constant 0 : index
    %c0_141 = arith.constant 0 : index
    %225 = vector.load %arg1[%c5_139, %c0_140, %c0_141] : memref<9x1x256xf32, #tpu.memory_space<vmem>>, vector<1x1x256xf32>
    %226 = vector.shape_cast %225 : vector<1x1x256xf32> to vector<1x256xf32>
    %c255_i32_142 = arith.constant 255 : i32
    %227 = tpu.dynamic_rotate %152 by %c255_i32_142 dim 1 : vector<8x256xf32>, i32 -> vector<8x256xf32>
    %228 = vector.broadcast %226 : vector<1x256xf32> to vector<8x256xf32>
    %229 = arith.mulf %227, %228 : vector<8x256xf32>
    %cst_143 = arith.constant dense<0.000000e+00> : vector<8x256xf32>
    %230 = tpu.matmul %224, %229, %cst_143 {dimension_numbers = #tpu.dot_dimension_numbers<[1], [0], [0], [1], [0, 0, 1, 1], [], []>} : vector<8x8xf32>, vector<8x256xf32>, vector<8x256xf32> -> vector<8x256xf32>
    %231 = arith.addf %220, %230 : vector<8x256xf32>
    %c255_i32_144 = arith.constant 255 : i32
    %232 = tpu.dynamic_rotate %158 by %c255_i32_144 dim 1 : vector<8x256xf32>, i32 -> vector<8x256xf32>
    %233 = vector.broadcast %226 : vector<1x256xf32> to vector<8x256xf32>
    %234 = arith.mulf %232, %233 : vector<8x256xf32>
    %cst_145 = arith.constant dense<0.000000e+00> : vector<8x256xf32>
    %235 = tpu.matmul %224, %234, %cst_145 {dimension_numbers = #tpu.dot_dimension_numbers<[1], [0], [0], [1], [0, 0, 1, 1], [], []>} : vector<8x8xf32>, vector<8x256xf32>, vector<8x256xf32> -> vector<8x256xf32>
    %236 = arith.addf %222, %235 : vector<8x256xf32>
    %c6_146 = arith.constant 6 : index
    %c0_147 = arith.constant 0 : index
    %c0_148 = arith.constant 0 : index
    %237 = vector.load %arg6[%c6_146, %c0_147, %c0_148] : memref<9x8x8xf32, #tpu.memory_space<vmem>>, vector<1x8x8xf32>
    %238 = vector.shape_cast %237 : vector<1x8x8xf32> to vector<8x8xf32>
    %c6_149 = arith.constant 6 : index
    %c0_150 = arith.constant 0 : index
    %c0_151 = arith.constant 0 : index
    %239 = vector.load %arg1[%c6_149, %c0_150, %c0_151] : memref<9x1x256xf32, #tpu.memory_space<vmem>>, vector<1x1x256xf32>
    %240 = vector.shape_cast %239 : vector<1x1x256xf32> to vector<1x256xf32>
    %c241_i32_152 = arith.constant 241 : i32
    %241 = tpu.dynamic_rotate %152 by %c241_i32_152 dim 1 : vector<8x256xf32>, i32 -> vector<8x256xf32>
    %242 = vector.broadcast %240 : vector<1x256xf32> to vector<8x256xf32>
    %243 = arith.mulf %241, %242 : vector<8x256xf32>
    %cst_153 = arith.constant dense<0.000000e+00> : vector<8x256xf32>
    %244 = tpu.matmul %238, %243, %cst_153 {dimension_numbers = #tpu.dot_dimension_numbers<[1], [0], [0], [1], [0, 0, 1, 1], [], []>} : vector<8x8xf32>, vector<8x256xf32>, vector<8x256xf32> -> vector<8x256xf32>
    %245 = arith.addf %231, %244 : vector<8x256xf32>
    %c241_i32_154 = arith.constant 241 : i32
    %246 = tpu.dynamic_rotate %158 by %c241_i32_154 dim 1 : vector<8x256xf32>, i32 -> vector<8x256xf32>
    %247 = vector.broadcast %240 : vector<1x256xf32> to vector<8x256xf32>
    %248 = arith.mulf %246, %247 : vector<8x256xf32>
    %cst_155 = arith.constant dense<0.000000e+00> : vector<8x256xf32>
    %249 = tpu.matmul %238, %248, %cst_155 {dimension_numbers = #tpu.dot_dimension_numbers<[1], [0], [0], [1], [0, 0, 1, 1], [], []>} : vector<8x8xf32>, vector<8x256xf32>, vector<8x256xf32> -> vector<8x256xf32>
    %250 = arith.addf %236, %249 : vector<8x256xf32>
    %c7_156 = arith.constant 7 : index
    %c0_157 = arith.constant 0 : index
    %c0_158 = arith.constant 0 : index
    %251 = vector.load %arg6[%c7_156, %c0_157, %c0_158] : memref<9x8x8xf32, #tpu.memory_space<vmem>>, vector<1x8x8xf32>
    %252 = vector.shape_cast %251 : vector<1x8x8xf32> to vector<8x8xf32>
    %c7_159 = arith.constant 7 : index
    %c0_160 = arith.constant 0 : index
    %c0_161 = arith.constant 0 : index
    %253 = vector.load %arg1[%c7_159, %c0_160, %c0_161] : memref<9x1x256xf32, #tpu.memory_space<vmem>>, vector<1x1x256xf32>
    %254 = vector.shape_cast %253 : vector<1x1x256xf32> to vector<1x256xf32>
    %c240_i32_162 = arith.constant 240 : i32
    %255 = tpu.dynamic_rotate %152 by %c240_i32_162 dim 1 : vector<8x256xf32>, i32 -> vector<8x256xf32>
    %256 = vector.broadcast %254 : vector<1x256xf32> to vector<8x256xf32>
    %257 = arith.mulf %255, %256 : vector<8x256xf32>
    %cst_163 = arith.constant dense<0.000000e+00> : vector<8x256xf32>
    %258 = tpu.matmul %252, %257, %cst_163 {dimension_numbers = #tpu.dot_dimension_numbers<[1], [0], [0], [1], [0, 0, 1, 1], [], []>} : vector<8x8xf32>, vector<8x256xf32>, vector<8x256xf32> -> vector<8x256xf32>
    %259 = arith.addf %245, %258 : vector<8x256xf32>
    %c240_i32_164 = arith.constant 240 : i32
    %260 = tpu.dynamic_rotate %158 by %c240_i32_164 dim 1 : vector<8x256xf32>, i32 -> vector<8x256xf32>
    %261 = vector.broadcast %254 : vector<1x256xf32> to vector<8x256xf32>
    %262 = arith.mulf %260, %261 : vector<8x256xf32>
    %cst_165 = arith.constant dense<0.000000e+00> : vector<8x256xf32>
    %263 = tpu.matmul %252, %262, %cst_165 {dimension_numbers = #tpu.dot_dimension_numbers<[1], [0], [0], [1], [0, 0, 1, 1], [], []>} : vector<8x8xf32>, vector<8x256xf32>, vector<8x256xf32> -> vector<8x256xf32>
    %264 = arith.addf %250, %263 : vector<8x256xf32>
    %c8_166 = arith.constant 8 : index
    %c0_167 = arith.constant 0 : index
    %c0_168 = arith.constant 0 : index
    %265 = vector.load %arg6[%c8_166, %c0_167, %c0_168] : memref<9x8x8xf32, #tpu.memory_space<vmem>>, vector<1x8x8xf32>
    %266 = vector.shape_cast %265 : vector<1x8x8xf32> to vector<8x8xf32>
    %c8_169 = arith.constant 8 : index
    %c0_170 = arith.constant 0 : index
    %c0_171 = arith.constant 0 : index
    %267 = vector.load %arg1[%c8_169, %c0_170, %c0_171] : memref<9x1x256xf32, #tpu.memory_space<vmem>>, vector<1x1x256xf32>
    %268 = vector.shape_cast %267 : vector<1x1x256xf32> to vector<1x256xf32>
    %c239_i32_172 = arith.constant 239 : i32
    %269 = tpu.dynamic_rotate %152 by %c239_i32_172 dim 1 : vector<8x256xf32>, i32 -> vector<8x256xf32>
    %270 = vector.broadcast %268 : vector<1x256xf32> to vector<8x256xf32>
    %271 = arith.mulf %269, %270 : vector<8x256xf32>
    %cst_173 = arith.constant dense<0.000000e+00> : vector<8x256xf32>
    %272 = tpu.matmul %266, %271, %cst_173 {dimension_numbers = #tpu.dot_dimension_numbers<[1], [0], [0], [1], [0, 0, 1, 1], [], []>} : vector<8x8xf32>, vector<8x256xf32>, vector<8x256xf32> -> vector<8x256xf32>
    %273 = arith.addf %259, %272 : vector<8x256xf32>
    %c239_i32_174 = arith.constant 239 : i32
    %274 = tpu.dynamic_rotate %158 by %c239_i32_174 dim 1 : vector<8x256xf32>, i32 -> vector<8x256xf32>
    %275 = vector.broadcast %268 : vector<1x256xf32> to vector<8x256xf32>
    %276 = arith.mulf %274, %275 : vector<8x256xf32>
    %cst_175 = arith.constant dense<0.000000e+00> : vector<8x256xf32>
    %277 = tpu.matmul %266, %276, %cst_175 {dimension_numbers = #tpu.dot_dimension_numbers<[1], [0], [0], [1], [0, 0, 1, 1], [], []>} : vector<8x8xf32>, vector<8x256xf32>, vector<8x256xf32> -> vector<8x256xf32>
    %278 = arith.addf %264, %277 : vector<8x256xf32>
    %cst_176 = arith.constant dense<0.000000e+00> : vector<8x1xf32>
    %279 = tpu.matmul %273, %0, %cst_176 {dimension_numbers = #tpu.dot_dimension_numbers<[1], [0], [0], [1], [0, 0, 1, 1], [], []>} : vector<8x256xf32>, vector<256x1xf32>, vector<8x1xf32> -> vector<8x1xf32>
    %cst_177 = arith.constant dense<0.000000e+00> : vector<8x1xf32>
    %280 = tpu.matmul %278, %0, %cst_177 {dimension_numbers = #tpu.dot_dimension_numbers<[1], [0], [0], [1], [0, 0, 1, 1], [], []>} : vector<8x256xf32>, vector<256x1xf32>, vector<8x1xf32> -> vector<8x1xf32>
    %281 = arith.addf %279, %280 : vector<8x1xf32>
    %cst_178 = arith.constant 0.001953125 : f32
    %282 = vector.broadcast %cst_178 : f32 to vector<8x1xf32>
    %283 = arith.mulf %281, %282 : vector<8x1xf32>
    %284 = vector.broadcast %283 : vector<8x1xf32> to vector<8x256xf32>
    %285 = arith.subf %273, %284 : vector<8x256xf32>
    %286 = vector.broadcast %283 : vector<8x1xf32> to vector<8x256xf32>
    %287 = arith.subf %278, %286 : vector<8x256xf32>
    %288 = arith.mulf %285, %285 : vector<8x256xf32>
    %cst_179 = arith.constant dense<0.000000e+00> : vector<8x1xf32>
    %289 = tpu.matmul %288, %0, %cst_179 {dimension_numbers = #tpu.dot_dimension_numbers<[1], [0], [0], [1], [0, 0, 1, 1], [], []>} : vector<8x256xf32>, vector<256x1xf32>, vector<8x1xf32> -> vector<8x1xf32>
    %290 = arith.mulf %287, %287 : vector<8x256xf32>
    %cst_180 = arith.constant dense<0.000000e+00> : vector<8x1xf32>
    %291 = tpu.matmul %290, %0, %cst_180 {dimension_numbers = #tpu.dot_dimension_numbers<[1], [0], [0], [1], [0, 0, 1, 1], [], []>} : vector<8x256xf32>, vector<256x1xf32>, vector<8x1xf32> -> vector<8x1xf32>
    %292 = arith.addf %289, %291 : vector<8x1xf32>
    %cst_181 = arith.constant 0.001953125 : f32
    %293 = vector.broadcast %cst_181 : f32 to vector<8x1xf32>
    %294 = arith.mulf %292, %293 : vector<8x1xf32>
    %c0_182 = arith.constant 0 : index
    %c0_183 = arith.constant 0 : index
    %295 = vector.load %arg7[%c0_182, %c0_183] : memref<8x1xf32, #tpu.memory_space<vmem>>, vector<8x1xf32>
    %cst_184 = arith.constant 9.99999974E-6 : f32
    %296 = vector.broadcast %cst_184 : f32 to vector<8x1xf32>
    %297 = arith.addf %294, %296 : vector<8x1xf32>
    %298 = math.rsqrt %297 : vector<8x1xf32>
    %299 = arith.mulf %295, %298 : vector<8x1xf32>
    %c0_185 = arith.constant 0 : index
    %c0_186 = arith.constant 0 : index
    %300 = vector.load %arg8[%c0_185, %c0_186] : memref<8x1xf32, #tpu.memory_space<vmem>>, vector<8x1xf32>
    %301 = vector.broadcast %299 : vector<8x1xf32> to vector<8x256xf32>
    %302 = arith.mulf %285, %301 : vector<8x256xf32>
    %303 = vector.broadcast %300 : vector<8x1xf32> to vector<8x256xf32>
    %304 = arith.addf %302, %303 : vector<8x256xf32>
    %cst_187 = arith.constant 0.000000e+00 : f32
    %305 = vector.broadcast %cst_187 : f32 to vector<8x256xf32>
    %306 = arith.maximumf %304, %305 : vector<8x256xf32>
    %307 = vector.broadcast %299 : vector<8x1xf32> to vector<8x256xf32>
    %308 = arith.mulf %287, %307 : vector<8x256xf32>
    %309 = vector.broadcast %300 : vector<8x1xf32> to vector<8x256xf32>
    %310 = arith.addf %308, %309 : vector<8x256xf32>
    %cst_188 = arith.constant 0.000000e+00 : f32
    %311 = vector.broadcast %cst_188 : f32 to vector<8x256xf32>
    %312 = arith.maximumf %310, %311 : vector<8x256xf32>
    %c0_189 = arith.constant 0 : index
    %c0_190 = arith.constant 0 : index
    %313 = vector.load %arg9[%c0_189, %c0_190] : memref<16x256xf32, #tpu.memory_space<vmem>>, vector<8x256xf32>
    tpu.vector_store %arg9[%c0_189, %c0_190], %306 {strides = array<i32>} : memref<16x256xf32, #tpu.memory_space<vmem>>, vector<8x256xf32>,
    %c8_191 = arith.constant 8 : index
    %c0_192 = arith.constant 0 : index
    %314 = vector.load %arg9[%c8_191, %c0_192] : memref<16x256xf32, #tpu.memory_space<vmem>>, vector<8x256xf32>
    tpu.vector_store %arg9[%c8_191, %c0_192], %312 {strides = array<i32>} : memref<16x256xf32, #tpu.memory_space<vmem>>, vector<8x256xf32>,
    return
  }
  func.func @transform_0(%arg0: i32) -> (i32, i32, i32) {
    %c0_i32 = arith.constant 0 : i32
    %c0_i32_0 = arith.constant 0 : i32
    %c0_i32_1 = arith.constant 0 : i32
    %c0_i32_2 = arith.constant 0 : i32
    return %c0_i32, %c0_i32_0, %c0_i32_1 : i32, i32, i32
  }
  func.func @transform_1(%arg0: i32) -> (i32, i32, i32) {
    %c0_i32 = arith.constant 0 : i32
    %c0_i32_0 = arith.constant 0 : i32
    %c0_i32_1 = arith.constant 0 : i32
    %c0_i32_2 = arith.constant 0 : i32
    return %c0_i32, %c0_i32_0, %c0_i32_1 : i32, i32, i32
  }
  func.func @transform_2(%arg0: i32) -> (i32, i32, i32) {
    %c0_i32 = arith.constant 0 : i32
    %c0_i32_0 = arith.constant 0 : i32
    %c0_i32_1 = arith.constant 0 : i32
    %c0_i32_2 = arith.constant 0 : i32
    return %c0_i32, %c0_i32_0, %c0_i32_1 : i32, i32, i32
  }
  func.func @transform_3(%arg0: i32) -> (i32, i32) {
    %c0_i32 = arith.constant 0 : i32
    %c0_i32_0 = arith.constant 0 : i32
    %c0_i32_1 = arith.constant 0 : i32
    return %c0_i32, %c0_i32_0 : i32, i32
  }
  func.func @transform_4(%arg0: i32) -> (i32, i32) {
    %c0_i32 = arith.constant 0 : i32
    %c0_i32_0 = arith.constant 0 : i32
    %c0_i32_1 = arith.constant 0 : i32
    return %c0_i32, %c0_i32_0 : i32, i32
  }
  func.func @transform_5(%arg0: i32) -> (i32, i32, i32) {
    %c0_i32 = arith.constant 0 : i32
    %c0_i32_0 = arith.constant 0 : i32
    %c0_i32_1 = arith.constant 0 : i32
    %c0_i32_2 = arith.constant 0 : i32
    return %c0_i32, %c0_i32_0, %c0_i32_1 : i32, i32, i32
  }
  func.func @transform_6(%arg0: i32) -> (i32, i32) {
    %c0_i32 = arith.constant 0 : i32
    %c0_i32_0 = arith.constant 0 : i32
    %c0_i32_1 = arith.constant 0 : i32
    return %c0_i32, %c0_i32_0 : i32, i32
  }
  func.func @transform_7(%arg0: i32) -> (i32, i32) {
    %c0_i32 = arith.constant 0 : i32
    %c0_i32_0 = arith.constant 0 : i32
    %c0_i32_1 = arith.constant 0 : i32
    return %c0_i32, %c0_i32_0 : i32, i32
  }
  func.func @transform_8(%arg0: i32) -> (i32, i32) {
    %c0_i32 = arith.constant 0 : i32
    %c0_i32_0 = arith.constant 0 : i32
    %c0_i32_1 = arith.constant 0 : i32
    return %c0_i32, %c0_i32_0 : i32, i32
  }
}

</mosaic_0001>

<bundles_post_ra>
// kernel: conv_cat_forward.1
= control target key start
LH: loop header
LB: loop body
LE: loop exit
PB: predicated region body
PF: predicated region fallthrough
CT: control target
= control target key end

     0   :  { %v4261_v1 = vmov 0.0   ;;  %s4262_s29 = smov 16   ;;  %s4263_s30 = smov 17   ;;  %v41_v5 = vlaneseq  ;;  %vm98_vm2 = vcmask 1043456   ;;  %vm94_vm3 = vcmask 31744   ;;  %s5231_s1 = inlined_call_operand.vmem [shape: f32[2,4,256], index: 1, kind: input, shape index: {}]   ;;  %s5232_s0 = inlined_call_operand.vmem [shape: f32[9,1,256], index: 0, kind: input, shape index: {}]   ;;  %s5233_s2 = inlined_call_operand.vmem [shape: f32[9,8,4], index: 2, kind: input, shape index: {}]   ;;  %s5234_s3 = inlined_call_operand.vmem [shape: f32[8,1], index: 3, kind: input, shape index: {}]   ;;  %s5235_s4 = inlined_call_operand.vmem [shape: f32[8,1], index: 4, kind: input, shape index: {}]   ;;  %s5236_s5 = inlined_call_operand.vmem [shape: f32[9,8,8], index: 5, kind: input, shape index: {}]   ;;  %s5237_s7 = inlined_call_operand.vmem [shape: f32[8,1], index: 7, kind: input, shape index: {}]   ;;  %s5238_s6 = inlined_call_operand.vmem [shape: f32[8,1], index: 6, kind: input, shape index: {}]   ;;  %s5239_s8 = inlined_call_operand.vmem [shape: f32[16,256], index: 8, kind: output, shape index: {}]  }
   0x1   :  { %v4320_v0 = vld [vmem:[%s5231_s1] sm:$0xff]  ;;  %249 = vmatprep.mubr.f32.mxu1 %v4261_v1  ;;  %169 = vmatprep.mubr.f32.mxu0 %v4261_v1  ;;  %v4335_v3 = vld [vmem:[%s5231_s1 + $0x8] sm:$0xff]  ;;  %s4264_s1 = smov 15   ;;  %s4265_s11 = smov 1   ;;  %v3881_v52 = vld [vmem:[%s5233_s2 + $0x10] sm:$0xff]  ;;  %vm2084_vm10 = vcmask 64512  }
   0x2   :  { %74 = vrot.lane.b32.xlu1 %v4320_v0, %s4262_s29  ;;  %37 = vrot.lane.b32.xlu0 %v4320_v0, %s4263_s30  ;;  %v4330_v2 = vcombine.high %v4320_v0, %v4320_v0  ;;  %v4343_v4 = vcombine.high %v4335_v3, %v4335_v3  ;;  %s4266_s12 = smov 127   ;;  %s4267_s13 = smov 113   ;;  %v48_v6 = vshrl.u32 %v41_v5, 7  ;;  %v4401_v7 = vand.u32 127, %v41_v5  ;;  %v3868_v10 = vld [vmem:[%s5232_s0 + $0x2] sm:$0x3] }
   0x3   :  { %s4268_s14 = smov 112   ;;  %s4269_s15 = smov 111   ;;  %v33_v11 = vld [vmem:[%s5232_s0] sm:$0x3]  ;;  %v3867_v29 = vld [vmem:[%s5233_s2 + $0x8] sm:$0xff] }
   0x4   :  { %v4403_v8 = vsub.s32 0, %v48_v6  ;;  %v4405_v9 = vsub.s32 1, %v48_v6  ;;  %vm78_vm0 = vcmp.lt.s32.totalorder %v4401_v7, 16  ;;  %vm43_vm1 = vcmp.lt.s32.totalorder %v4401_v7, 17  ;;  %v32_v28 = vld [vmem:[%s5233_s2] sm:$0xff] }
   0x5   :  { %v3882_v36 = vld [vmem:[%s5232_s0 + $0x4] sm:$0x3]  ;;  %vm426_vm4 = vcmp.lt.s32.totalorder %v4401_v7, 15  ;;  %v3890_v51 = vld [vmem:[%s5232_s0 + $0x6] sm:$0x3]  ;;  %vm619_vm5 = vcmp.lt.s32.totalorder %v4401_v7, 1 }
   0x6   :  { %76 = vrot.lane.b32.xlu1 %v4330_v2, %s4262_s29  ;;  %39 = vrot.lane.b32.xlu0 %v4330_v2, %s4263_s30  ;;  %v4416_v14 = vrot.slane %v3868_v10, %v4403_v8  ;;  %v4419_v15 = vrot.slane %v33_v11, %v4403_v8  ;;  %v4422_v16 = vrot.slane %v33_v11, %v4405_v9  ;;  %v3905_v11 = vld [vmem:[%s5232_s0 + $0xa] sm:$0x3]  ;;  %vm971_vm6 = vcmp.lt.s32.totalorder %v4401_v7, 127 }
   0x7   :  { %v4425_v17 = vrot.slane %v3868_v10, %v4405_v9  ;;  %v4472_v43 = vrot.slane %v3882_v36, %v4403_v8  ;;  %v4475_v44 = vrot.slane %v3882_v36, %v4405_v9  ;;  %v4505_v59 = vrot.slane %v3890_v51, %v4403_v8 }
   0x8   :  { %v4508_v60 = vrot.slane %v3890_v51, %v4405_v9  ;;  %vm1164_vm7 = vcmp.lt.s32.totalorder %v4401_v7, 113  ;;  %vm1357_vm8 = vcmp.lt.s32.totalorder %v4401_v7, 112  ;;  %vm1550_vm9 = vcmp.lt.s32.totalorder %v4401_v7, 111 }
   0xa   :  { %64 = vrot.lane.b32.xlu1 %v4343_v4, %s4263_s30  ;;  %62 = vrot.lane.b32.xlu0 %v4335_v3, %s4263_s30 }
   0xe   :  { %258 = vrot.lane.b32.xlu1 %v4343_v4, %s4262_s29  ;;  %256 = vrot.lane.b32.xlu0 %v4335_v3, %s4262_s29 }
  0x12   :  { %424 = vrot.lane.b32.xlu1 %v4330_v2, %s4264_s1  ;;  %422 = vrot.lane.b32.xlu0 %v4320_v0, %s4264_s1 }
  0x16   :  { %526 = vrot.lane.b32.xlu1 %v4343_v4, %s4264_s1  ;;  %524 = vrot.lane.b32.xlu0 %v4335_v3, %s4264_s1 }
  0x1a   :  { %617 = vrot.lane.b32.xlu1 %v4330_v2, %s4265_s11  ;;  %615 = vrot.lane.b32.xlu0 %v4320_v0, %s4265_s11 }
  0x1e   :  { %719 = vrot.lane.b32.xlu1 %v4343_v4, %s4265_s11  ;;  %717 = vrot.lane.b32.xlu0 %v4335_v3, %s4265_s11 }
  0x22   :  { %969 = vrot.lane.b32.xlu1 %v4330_v2, %s4266_s12  ;;  %967 = vrot.lane.b32.xlu0 %v4320_v0, %s4266_s12 }
  0x26   :  { %1071 = vrot.lane.b32.xlu1 %v4343_v4, %s4266_s12  ;;  %1069 = vrot.lane.b32.xlu0 %v4335_v3, %s4266_s12 }
  0x2a   :  { %1162 = vrot.lane.b32.xlu1 %v4330_v2, %s4267_s13  ;;  %1160 = vrot.lane.b32.xlu0 %v4320_v0, %s4267_s13 }
  0x2e   :  { %1264 = vrot.lane.b32.xlu1 %v4343_v4, %s4267_s13  ;;  %1262 = vrot.lane.b32.xlu0 %v4335_v3, %s4267_s13 }
  0x32   :  { %1355 = vrot.lane.b32.xlu1 %v4330_v2, %s4268_s14  ;;  %1353 = vrot.lane.b32.xlu0 %v4320_v0, %s4268_s14 }
  0x36   :  { %1457 = vrot.lane.b32.xlu1 %v4343_v4, %s4268_s14  ;;  %1455 = vrot.lane.b32.xlu0 %v4335_v3, %s4268_s14 }
  0x3a   :  { %1548 = vrot.lane.b32.xlu1 %v4330_v2, %s4269_s15  ;;  %1546 = vrot.lane.b32.xlu0 %v4320_v0, %s4269_s15 }
  0x3e   :  { %1650 = vrot.lane.b32.xlu1 %v4343_v4, %s4269_s15  ;;  %1648 = vrot.lane.b32.xlu0 %v4335_v3, %s4269_s15 }
  0x74   :  { %v75_v12 = vpop.permute.xlu1 %74  ;;  %v38_v13 = vpop.permute.xlu0 %37 }
  0x78   :  { %v77_v18 = vpop.permute.xlu1 %76  ;;  %v40_v19 = vpop.permute.xlu0 %39 }
  0x79   :  { %v79_v20 = vsel %vm78_vm0, %v75_v12, %v77_v18  ;;  %v80_v21 = vsel %vm78_vm0, %v77_v18, %v75_v12  ;;  %v44_v22 = vsel %vm43_vm1, %v38_v13, %v40_v19  ;;  %v45_v23 = vsel %vm43_vm1, %v40_v19, %v38_v13  ;;  %v3889_v12 = vld [vmem:[%s5233_s2 + $0x18] sm:$0xff] }
  0x7a   :  { %v92_v24 = vmul.f32 %v4416_v14, %v80_v21  ;;  %v57_v25 = vmul.f32 %v4419_v15, %v45_v23  ;;  %v93_v26 = vmul.f32 %v4425_v17, %v79_v20  ;;  %v58_v27 = vmul.f32 %v4422_v16, %v44_v22 }
  0x7b   :  { %v4535_v21 = vrot.slane %v3905_v11, %v4403_v8 }
  0x7c   :  { %v65_v30 = vpop.permute.xlu1 %64  ;;  %v63_v31 = vpop.permute.xlu0 %62  ;;  %3869 = vmatprep.subr.msk.mxu0 %vm98_vm2, %v93_v26  ;;  %3872 = vmatprep.subr.msk.mxu1 %vm98_vm2, %v58_v27 }
  0x7d   :  { %v66_v32 = vsel %vm43_vm1, %v63_v31, %v65_v30  ;;  %v67_v33 = vsel %vm43_vm1, %v65_v30, %v63_v31  ;;  %3870 = vmatpush1.msk.msra.mxu0 %vm98_vm2, %v92_v24  ;;  %3873 = vmatpush1.msk.msra.mxu1 %vm98_vm2, %v57_v25  ;;  %v4541_v24 = vrot.slane %v3905_v11, %v4405_v9  ;;  %v3897_v25 = vld [vmem:[%s5233_s2 + $0x20] sm:$0xff]  ;;  %v3913_v30 = vld [vmem:[%s5232_s0 + $0xc] sm:$0x3] }
  0x7e   :  { %v68_v34 = vmul.f32 %v67_v33, %v4419_v15  ;;  %v69_v35 = vmul.f32 %v66_v32, %v4422_v16  ;;  %3874 = vmatmul.mubr.msk.f32.vlgmr.msra.gmra.mxu1 %vm94_vm3, %v32_v28  ;;  %3871 = vmatmul.mubr.msk.f32.vlgmr.msra.gmra.mxu0 %vm94_vm3, %v3867_v29  ;;  %v3904_v31 = vld [vmem:[%s5233_s2 + $0x28] sm:$0xff] }
  0x7f   :  { %334 = vmatprep.mubr.f32.mxu0 %v4261_v1  ;;  %411 = vmatprep.mubr.f32.mxu1 %v4261_v1 }
  0x80   :  { %v259_v37 = vpop.permute.xlu1 %258  ;;  %v257_v38 = vpop.permute.xlu0 %256  ;;  %3878 = vmatprep.subr.msk.mxu1 %vm98_vm2, %v69_v35 }
  0x81   :  { %v260_v39 = vsel %vm78_vm0, %v257_v38, %v259_v37  ;;  %v261_v40 = vsel %vm78_vm0, %v259_v37, %v257_v38  ;;  %3879 = vmatpush1.msk.msra.mxu1 %vm98_vm2, %v68_v34 }
  0x82   :  { %v262_v41 = vmul.f32 %v261_v40, %v4416_v14  ;;  %v263_v42 = vmul.f32 %v260_v39, %v4425_v17  ;;  %3880 = vmatmul.mubr.msk.f32.vlgmr.msra.gmra.mxu1 %vm94_vm3, %v32_v28 }
  0x83   :  { %602 = vmatprep.mubr.f32.mxu1 %v4261_v1 }
  0x84   :  { %v425_v45 = vpop.permute.xlu1 %424  ;;  %v423_v46 = vpop.permute.xlu0 %422  ;;  %3875 = vmatprep.subr.msk.mxu0 %vm98_vm2, %v263_v42 }
  0x85   :  { %v427_v47 = vsel %vm426_vm4, %v423_v46, %v425_v45  ;;  %v428_v48 = vsel %vm426_vm4, %v425_v45, %v423_v46  ;;  %3876 = vmatpush1.msk.msra.mxu0 %vm98_vm2, %v262_v41  ;;  %v3912_v46 = vld [vmem:[%s5233_s2 + $0x30] sm:$0xff] }
  0x86   :  { %v440_v49 = vmul.f32 %v4472_v43, %v428_v48  ;;  %v441_v50 = vmul.f32 %v4475_v44, %v427_v47  ;;  %3877 = vmatmul.mubr.msk.f32.vlgmr.msra.gmra.mxu0 %vm94_vm3, %v3867_v29  ;;  %v3921_v47 = vld [vmem:[%s5232_s0 + $0xe] sm:$0x3] }
  0x87   :  { %515 = vmatprep.mubr.f32.mxu0 %v4261_v1 }
  0x88   :  { %v527_v53 = vpop.permute.xlu1 %526  ;;  %v525_v54 = vpop.permute.xlu0 %524  ;;  %3883 = vmatprep.subr.msk.mxu0 %vm98_vm2, %v441_v50 }
  0x89   :  { %v528_v55 = vsel %vm426_vm4, %v525_v54, %v527_v53  ;;  %v529_v56 = vsel %vm426_vm4, %v527_v53, %v525_v54  ;;  %3884 = vmatpush1.msk.msra.mxu0 %vm98_vm2, %v440_v49  ;;  %v4620_v54 = vrot.slane %v3921_v47, %v4403_v8 }
  0x8a   :  { %v530_v57 = vmul.f32 %v529_v56, %v4472_v43  ;;  %v531_v58 = vmul.f32 %v528_v55, %v4475_v44  ;;  %3885 = vmatmul.mubr.msk.f32.vlgmr.msra.gmra.mxu0 %vm94_vm3, %v3881_v52  ;;  %v4623_v55 = vrot.slane %v3921_v47, %v4405_v9 }
  0x8b   :  { %708 = vmatprep.mubr.f32.mxu0 %v4261_v1 }
  0x8c   :  { %v618_v61 = vpop.permute.xlu1 %617  ;;  %v616_v62 = vpop.permute.xlu0 %615  ;;  %3886 = vmatprep.subr.msk.mxu1 %vm98_vm2, %v531_v58 }
  0x8d   :  { %v620_v63 = vsel %vm619_vm5, %v616_v62, %v618_v61  ;;  %v621_v5 = vsel %vm619_vm5, %v618_v61, %v616_v62  ;;  %3887 = vmatpush1.msk.msra.mxu1 %vm98_vm2, %v530_v57 }
  0x8e   :  { %v633_v6 = vmul.f32 %v4505_v59, %v621_v5  ;;  %v634_v10 = vmul.f32 %v4508_v60, %v620_v63  ;;  %3888 = vmatmul.mubr.msk.f32.vlgmr.msra.gmra.mxu1 %vm94_vm3, %v3881_v52  ;;  %v3920_v5 = vld [vmem:[%s5233_s2 + $0x38] sm:$0xff] }
  0x8f   :  { %795 = vmatprep.mubr.f32.mxu1 %v4261_v1 }
  0x90   :  { %v720_v13 = vpop.permute.xlu1 %719  ;;  %v718_v18 = vpop.permute.xlu0 %717  ;;  %3891 = vmatprep.subr.msk.mxu0 %vm98_vm2, %v634_v10 }
  0x91   :  { %v721_v19 = vsel %vm619_vm5, %v718_v18, %v720_v13  ;;  %v722_v20 = vsel %vm619_vm5, %v720_v13, %v718_v18  ;;  %3892 = vmatpush1.msk.msra.mxu0 %vm98_vm2, %v633_v6  ;;  %v3929_v6 = vld [vmem:[%s5232_s0 + $0x10] sm:$0x3] }
  0x92   :  { %v723_v22 = vmul.f32 %v722_v20, %v4505_v59  ;;  %v724_v23 = vmul.f32 %v721_v19, %v4508_v60  ;;  %3893 = vmatmul.mubr.msk.f32.vlgmr.msra.gmra.mxu0 %vm94_vm3, %v3889_v12  ;;  %3898 = vmatprep.subr.msk.mxu0 %vm98_vm2, %v4330_v2  ;;  %v4653_v20 = vrot.slane %v3929_v6, %v4403_v8 }
  0x93   :  { %3899 = vmatpush1.msk.msra.mxu0 %vm98_vm2, %v4320_v0  ;;  %877 = vmatprep.mubr.f32.mxu0 %v4261_v1 }
  0x94   :  { %v970_v26 = vpop.permute.xlu1 %969  ;;  %v968_v27 = vpop.permute.xlu0 %967  ;;  %3894 = vmatprep.subr.msk.mxu1 %vm98_vm2, %v724_v23 }
  0x95   :  { %v972_v28 = vsel %vm971_vm6, %v968_v27, %v970_v26  ;;  %v973_v29 = vsel %vm971_vm6, %v970_v26, %v968_v27  ;;  %3895 = vmatpush1.msk.msra.mxu1 %vm98_vm2, %v723_v22  ;;  %v4656_v22 = vrot.slane %v3929_v6, %v4405_v9 }
  0x96   :  { %v985_v0 = vmul.f32 %v4535_v21, %v972_v28  ;;  %v986_v2 = vmul.f32 %v4541_v24, %v973_v29  ;;  %3896 = vmatmul.mubr.msk.f32.vlgmr.msra.gmra.mxu1 %vm94_vm3, %v3889_v12  ;;  %3900 = vmatmul.mubr.msk.f32.vlgmr.msra.gmra.mxu0 %vm94_vm3, %v3897_v25 }
  0x97   :  { %3901 = vmatprep.subr.msk.mxu1 %vm98_vm2, %v4343_v4  ;;  %954 = vmatprep.mubr.f32.mxu1 %v4261_v1  ;;  %v4581_v4 = vrot.slane %v3913_v30, %v4403_v8 }
  0x98   :  { %v1072_v32 = vpop.permute.xlu1 %1071  ;;  %v1070_v33 = vpop.permute.xlu0 %1069  ;;  %3906 = vmatprep.subr.msk.mxu0 %vm98_vm2, %v986_v2  ;;  %3902 = vmatpush1.msk.msra.mxu1 %vm98_vm2, %v4335_v3  ;;  %v4587_v3 = vrot.slane %v3913_v30, %v4405_v9  ;;  %v3928_v9 = vld [vmem:[%s5233_s2 + $0x40] sm:$0xff] }
  0x99   :  { %v1073_v34 = vsel %vm971_vm6, %v1070_v33, %v1072_v32  ;;  %v1074_v35 = vsel %vm971_vm6, %v1072_v32, %v1070_v33  ;;  %3907 = vmatpush1.msk.msra.mxu0 %vm98_vm2, %v985_v0  ;;  %1060 = vmatprep.mubr.f32.mxu0 %v4261_v1  ;;  %v4270_v33 = vmov 1.0  }
  0x9a   :  { %v1075_v36 = vmul.f32 %v1073_v34, %v4535_v21  ;;  %v1076_v37 = vmul.f32 %v1074_v35, %v4541_v24  ;;  %3903 = vmatmul.mubr.msk.f32.vlgmr.msra.gmra.mxu1 %vm94_vm3, %v3897_v25  ;;  %3908 = vmatmul.mubr.msk.f32.vlgmr.msra.gmra.mxu0 %vm94_vm3, %v3904_v31 }
  0x9b   :  { %1147 = vmatprep.mubr.f32.mxu1 %v4261_v1  ;;  %1253 = vmatprep.mubr.f32.mxu0 %v4261_v1 }
  0x9c   :  { %v1163_v38 = vpop.permute.xlu1 %1162  ;;  %v1161_v39 = vpop.permute.xlu0 %1160  ;;  %3909 = vmatprep.subr.msk.mxu1 %vm98_vm2, %v1076_v37 }
  0x9d   :  { %v1165_v40 = vsel %vm1164_vm7, %v1161_v39, %v1163_v38  ;;  %v1166_v41 = vsel %vm1164_vm7, %v1163_v38, %v1161_v39  ;;  %3910 = vmatpush1.msk.msra.mxu1 %vm98_vm2, %v1075_v36 }
  0x9e   :  { %v1178_v42 = vmul.f32 %v4581_v4, %v1165_v40  ;;  %v1179_v45 = vmul.f32 %v4587_v3, %v1166_v41  ;;  %3911 = vmatmul.mubr.msk.f32.vlgmr.msra.gmra.mxu1 %vm94_vm3, %v3904_v31 }
  0x9f   :  { %1340 = vmatprep.mubr.f32.mxu1 %v4261_v1 }
  0xa0   :  { %v1265_v48 = vpop.permute.xlu1 %1264  ;;  %v1263_v49 = vpop.permute.xlu0 %1262  ;;  %3914 = vmatprep.subr.msk.mxu0 %vm98_vm2, %v1179_v45 }
  0xa1   :  { %v1266_v50 = vsel %vm1164_vm7, %v1263_v49, %v1265_v48  ;;  %v1267_v51 = vsel %vm1164_vm7, %v1265_v48, %v1263_v49  ;;  %3915 = vmatpush1.msk.msra.mxu0 %vm98_vm2, %v1178_v42 }
  0xa2   :  { %v1268_v52 = vmul.f32 %v1266_v50, %v4581_v4  ;;  %v1269_v53 = vmul.f32 %v1267_v51, %v4587_v3  ;;  %3916 = vmatmul.mubr.msk.f32.vlgmr.msra.gmra.mxu0 %vm94_vm3, %v3912_v46 }
  0xa3   :  { %1446 = vmatprep.mubr.f32.mxu0 %v4261_v1 }
  0xa4   :  { %v1356_v56 = vpop.permute.xlu1 %1355  ;;  %v1354_v57 = vpop.permute.xlu0 %1353  ;;  %3917 = vmatprep.subr.msk.mxu1 %vm98_vm2, %v1269_v53 }
  0xa5   :  { %v1358_v58 = vsel %vm1357_vm8, %v1354_v57, %v1356_v56  ;;  %v1359_v61 = vsel %vm1357_vm8, %v1356_v56, %v1354_v57  ;;  %3918 = vmatpush1.msk.msra.mxu1 %vm98_vm2, %v1268_v52 }
  0xa6   :  { %v1371_v62 = vmul.f32 %v4620_v54, %v1358_v58  ;;  %v1372_v63 = vmul.f32 %v4623_v55, %v1359_v61  ;;  %3919 = vmatmul.mubr.msk.f32.vlgmr.msra.gmra.mxu1 %vm94_vm3, %v3912_v46 }
  0xa7   :  { %1533 = vmatprep.mubr.f32.mxu1 %v4261_v1 }
  0xa8   :  { %v1458_v10 = vpop.permute.xlu1 %1457  ;;  %v1456_v11 = vpop.permute.xlu0 %1455  ;;  %3922 = vmatprep.subr.msk.mxu0 %vm98_vm2, %v1372_v63 }
  0xa9   :  { %v1459_v12 = vsel %vm1357_vm8, %v1456_v11, %v1458_v10  ;;  %v1460_v13 = vsel %vm1357_vm8, %v1458_v10, %v1456_v11  ;;  %3923 = vmatpush1.msk.msra.mxu0 %vm98_vm2, %v1371_v62 }
  0xaa   :  { %v1461_v18 = vmul.f32 %v1459_v12, %v4620_v54  ;;  %v1462_v19 = vmul.f32 %v1460_v13, %v4623_v55  ;;  %3924 = vmatmul.mubr.msk.f32.vlgmr.msra.gmra.mxu0 %vm94_vm3, %v3920_v5 }
  0xab   :  { %1639 = vmatprep.mubr.f32.mxu0 %v4261_v1 }
  0xac   :  { %v1549_v23 = vpop.permute.xlu1 %1548  ;;  %v1547_v25 = vpop.permute.xlu0 %1546  ;;  %3925 = vmatprep.subr.msk.mxu1 %vm98_vm2, %v1462_v19 }
  0xad   :  { %v1551_v26 = vsel %vm1550_vm9, %v1547_v25, %v1549_v23  ;;  %v1552_v27 = vsel %vm1550_vm9, %v1549_v23, %v1547_v25  ;;  %3926 = vmatpush1.msk.msra.mxu1 %vm98_vm2, %v1461_v18 }
  0xae   :  { %v1564_v8 = vmul.f32 %v4653_v20, %v1551_v26  ;;  %v1565_v28 = vmul.f32 %v4656_v22, %v1552_v27  ;;  %3927 = vmatmul.mubr.msk.f32.vlgmr.msra.gmra.mxu1 %vm94_vm3, %v3920_v5 }
  0xaf   :  { %1726 = vmatprep.mubr.f32.mxu1 %v4261_v1 }
  0xb0   :  { %v1651_v29 = vpop.permute.xlu1 %1650  ;;  %v1649_v0 = vpop.permute.xlu0 %1648  ;;  %3930 = vmatprep.subr.msk.mxu0 %vm98_vm2, %v1565_v28 }
  0xb1   :  { %v1652_v2 = vsel %vm1550_vm9, %v1649_v0, %v1651_v29  ;;  %v1653_v30 = vsel %vm1550_vm9, %v1651_v29, %v1649_v0  ;;  %3931 = vmatpush1.msk.msra.mxu0 %vm98_vm2, %v1564_v8 }
  0xb2   :  { %v1654_v31 = vmul.f32 %v1652_v2, %v4653_v20  ;;  %v1655_v32 = vmul.f32 %v1653_v30, %v4656_v22  ;;  %3932 = vmatmul.mubr.msk.f32.vlgmr.msra.gmra.mxu0 %vm94_vm3, %v3928_v9  ;;  %3962 = vmatprep.subr.mxu0 %v4270_v33 }
  0xb3   :  { %3963 = vmatpush3.msra.mxu0 %v4270_v33 }
  0xb4   :  { %3933 = vmatprep.subr.msk.mxu1 %vm98_vm2, %v1655_v32  ;;  %3964 = vmatprep.subr.mxu0 %v4270_v33 }
  0xb5   :  { %3934 = vmatpush1.msk.msra.mxu1 %vm98_vm2, %v1654_v31  ;;  %3965 = vmatpush3.msra.mxu0 %v4270_v33 }
  0xb6   :  { %3935 = vmatmul.mubr.msk.f32.vlgmr.msra.gmra.mxu1 %vm94_vm3, %v3928_v9  ;;  %3997 = vmatprep.subr.mxu1 %v4270_v33 }
  0xb7   :  { %3998 = vmatpush3.msra.mxu1 %v4270_v33  ;;  %3966 = vmatprep.subr.mxu0 %v4270_v33 }
  0xb8   :  { %3999 = vmatprep.subr.mxu1 %v4270_v33  ;;  %3967 = vmatpush3.msra.mxu0 %v4270_v33 }
  0xb9   :  { %4000 = vmatpush3.msra.mxu1 %v4270_v33  ;;  %3968 = vmatprep.subr.mxu0 %v4270_v33 }
  0xba   :  { %4001 = vmatprep.subr.mxu1 %v4270_v33  ;;  %3969 = vmatpush3.msra.mxu0 %v4270_v33 }
  0xbb   :  { %4002 = vmatpush3.msra.mxu1 %v4270_v33  ;;  %3970 = vmatprep.subr.mxu0 %v4270_v33 }
  0xbc   :  { %4003 = vmatprep.subr.mxu1 %v4270_v33  ;;  %3971 = vmatpush3.msra.mxu0 %v4270_v33 }
  0xbd   :  { %4004 = vmatpush3.msra.mxu1 %v4270_v33  ;;  %3972 = vmatprep.subr.mxu0 %v4270_v33 }
  0xbe   :  { %4005 = vmatprep.subr.mxu1 %v4270_v33  ;;  %3973 = vmatpush3.msra.mxu0 %v4270_v33 }
  0xbf   :  { %4006 = vmatpush3.msra.mxu1 %v4270_v33  ;;  %3974 = vmatprep.subr.mxu0 %v4270_v33 }
  0xc0   :  { %4007 = vmatprep.subr.mxu1 %v4270_v33  ;;  %3975 = vmatpush3.msra.mxu0 %v4270_v33 }
  0xc1   :  { %4008 = vmatpush3.msra.mxu1 %v4270_v33  ;;  %3976 = vmatprep.subr.mxu0 %v4270_v33 }
  0xc2   :  { %4009 = vmatprep.subr.mxu1 %v4270_v33  ;;  %3977 = vmatpush3.msra.mxu0 %v4270_v33 }
  0xc3   :  { %4010 = vmatpush3.msra.mxu1 %v4270_v33  ;;  %3978 = vmatprep.subr.mxu0 %v4270_v33 }
  0xc4   :  { %4011 = vmatprep.subr.mxu1 %v4270_v33  ;;  %3979 = vmatpush3.msra.mxu0 %v4270_v33 }
  0xc5   :  { %4012 = vmatpush3.msra.mxu1 %v4270_v33  ;;  %3980 = vmatprep.subr.mxu0 %v4270_v33 }
  0xc6   :  { %4013 = vmatprep.subr.mxu1 %v4270_v33  ;;  %3981 = vmatpush3.msra.mxu0 %v4270_v33 }
  0xc7   :  { %4014 = vmatpush3.msra.mxu1 %v4270_v33  ;;  %3982 = vmatprep.subr.mxu0 %v4270_v33 }
  0xc8   :  { %4015 = vmatprep.subr.mxu1 %v4270_v33  ;;  %3983 = vmatpush3.msra.mxu0 %v4270_v33 }
  0xc9   :  { %4016 = vmatpush3.msra.mxu1 %v4270_v33  ;;  %3984 = vmatprep.subr.mxu0 %v4270_v33 }
  0xca   :  { %4017 = vmatprep.subr.mxu1 %v4270_v33  ;;  %3985 = vmatpush3.msra.mxu0 %v4270_v33 }
  0xcb   :  { %4018 = vmatpush3.msra.mxu1 %v4270_v33  ;;  %3986 = vmatprep.subr.mxu0 %v4270_v33 }
  0xcc   :  { %4019 = vmatprep.subr.mxu1 %v4270_v33  ;;  %3987 = vmatpush3.msra.mxu0 %v4270_v33 }
  0xcd   :  { %4020 = vmatpush3.msra.mxu1 %v4270_v33  ;;  %3988 = vmatprep.subr.mxu0 %v4270_v33 }
  0xce   :  { %4021 = vmatprep.subr.mxu1 %v4270_v33  ;;  %3989 = vmatpush3.msra.mxu0 %v4270_v33 }
  0xcf   :  { %4022 = vmatpush3.msra.mxu1 %v4270_v33  ;;  %3990 = vmatprep.subr.mxu0 %v4270_v33 }
  0xd0   :  { %4023 = vmatprep.subr.mxu1 %v4270_v33  ;;  %3991 = vmatpush3.msra.mxu0 %v4270_v33 }
  0xd1   :  { %4024 = vmatpush3.msra.mxu1 %v4270_v33  ;;  %3992 = vmatprep.subr.mxu0 %v4270_v33 }
  0xd2   :  { %4025 = vmatprep.subr.mxu1 %v4270_v33  ;;  %3993 = vmatpush3.msra.mxu0 %v4270_v33 }
  0xd3   :  { %4026 = vmatpush3.msra.mxu1 %v4270_v33  ;;  %4032 = vmatprep.subr.mxu0 %v4270_v33 }
  0xd4   :  { %4027 = vmatprep.subr.mxu1 %v4270_v33 }
  0xd5   :  { %4028 = vmatpush3.msra.mxu1 %v4270_v33 }
  0xd6   :  { %4067 = vmatprep.subr.mxu1 %v4270_v33 }
 0x13e   :  { %v171_v34 = vpop.f32.mrf.mxu0  ;;  %v251_v35 = vpop.f32.mrf.mxu1 }
 0x13f   :  { %v252_v58 = vadd.f32 %v251_v35, %v171_v34 }
 0x140   :  { %v173_v36 = vpop.f32.mrf.mxu0  ;;  %v253_v37 = vpop.f32.mrf.mxu1 }
 0x141   :  { %v254_v57 = vadd.f32 %v253_v37, %v173_v36 }
 0x142   :  { %v413_v39 = vpop.f32.mrf.mxu1 }
 0x144   :  { %v415_v42 = vpop.f32.mrf.mxu1 }
 0x146   :  { %v336_v38 = vpop.f32.mrf.mxu0 }
 0x147   :  { %v414_v6 = vadd.f32 %v413_v39, %v336_v38 }
 0x148   :  { %v338_v40 = vpop.f32.mrf.mxu0 }
 0x149   :  { %v416_v63 = vadd.f32 %v415_v42, %v338_v40 }
 0x14a   :  { %v517_v41 = vpop.f32.mrf.mxu0 }
 0x14b   :  { %v522_v10 = vadd.f32 %v517_v41, %v252_v58 }
 0x14c   :  { %v519_v45 = vpop.f32.mrf.mxu0 }
 0x14d   :  { %v523_v5 = vadd.f32 %v519_v45, %v254_v57 }
 0x14e   :  { %v604_v46 = vpop.f32.mrf.mxu1 }
 0x14f   :  { %v609_v23 = vadd.f32 %v604_v46, %v414_v6 }
 0x150   :  { %v606_v48 = vpop.f32.mrf.mxu1 }
 0x151   :  { %v610_v18 = vadd.f32 %v606_v48, %v416_v63  ;;  %v4271_v63 = vmov 0  }
 0x152   :  { %v710_v47 = vpop.f32.mrf.mxu0  ;;  %4253 = vset.pattern.permute.xlu0 %v4271_v63  ;;  %4254 = vset.pattern.permute.xlu1 %v4271_v63 }
 0x153   :  { %v715_v25 = vadd.f32 %v710_v47, %v522_v10 }
 0x154   :  { %v712_v49 = vpop.f32.mrf.mxu0 }
 0x155   :  { %v716_v19 = vadd.f32 %v712_v49, %v523_v5 }
 0x156   :  { %v797_v50 = vpop.f32.mrf.mxu1  ;;  %v879_v51 = vpop.f32.mrf.mxu0 }
 0x157   :  { %v802_v29 = vadd.f32 %v797_v50, %v609_v23  ;;  %v884_v0 = vadd.f32 %v879_v51, %v715_v25 }
 0x158   :  { %v799_v52 = vpop.f32.mrf.mxu1  ;;  %v881_v53 = vpop.f32.mrf.mxu0 }
 0x159   :  { %v803_v28 = vadd.f32 %v799_v52, %v610_v18  ;;  %v885_v9 = vadd.f32 %v881_v53, %v716_v19 }
 0x15a   :  { %v956_v56 = vpop.f32.mrf.mxu1  ;;  %v1062_v61 = vpop.f32.mrf.mxu0 }
 0x15b   :  { %v961_v34 = vadd.f32 %v956_v56, %v802_v29  ;;  %v1067_v35 = vadd.f32 %v1062_v61, %v884_v0 }
 0x15c   :  { %v958_v62 = vpop.f32.mrf.mxu1  ;;  %v1064_v11 = vpop.f32.mrf.mxu0 }
 0x15d   :  { %v962_v31 = vadd.f32 %v958_v62, %v803_v28  ;;  %v1068_v32 = vadd.f32 %v1064_v11, %v885_v9 }
 0x15e   :  { %v1149_v12 = vpop.f32.mrf.mxu1 }
 0x15f   :  { %v1154_v45 = vadd.f32 %v1149_v12, %v961_v34 }
 0x160   :  { %v1151_v26 = vpop.f32.mrf.mxu1 }
 0x161   :  { %v1155_v41 = vadd.f32 %v1151_v26, %v962_v31 }
 0x162   :  { %v1255_v13 = vpop.f32.mrf.mxu0 }
 0x163   :  { %v1260_v39 = vadd.f32 %v1255_v13, %v1067_v35 }
 0x164   :  { %v1257_v27 = vpop.f32.mrf.mxu0 }
 0x165   :  { %v1261_v38 = vadd.f32 %v1257_v27, %v1068_v32 }
 0x166   :  { %v1342_v8 = vpop.f32.mrf.mxu1 }
 0x167   :  { %v1347_v51 = vadd.f32 %v1342_v8, %v1154_v45 }
 0x168   :  { %v1344_v30 = vpop.f32.mrf.mxu1 }
 0x169   :  { %v1348_v49 = vadd.f32 %v1344_v30, %v1155_v41 }
 0x16a   :  { %v1448_v2 = vpop.f32.mrf.mxu0 }
 0x16b   :  { %v1453_v46 = vadd.f32 %v1448_v2, %v1260_v39  ;;  %v2030_v39 = vld [vmem:[%s5234_s3] sm:$0xff] }
 0x16c   :  { %v1450_v36 = vpop.f32.mrf.mxu0 }
 0x16d   :  { %v1454_v42 = vadd.f32 %v1450_v36, %v1261_v38 }
 0x16e   :  { %v1535_v37 = vpop.f32.mrf.mxu1 }
 0x16f   :  { %v1540_v57 = vadd.f32 %v1535_v37, %v1347_v51 }
 0x170   :  { %v1537_v47 = vpop.f32.mrf.mxu1 }
 0x171   :  { %v1541_v56 = vadd.f32 %v1537_v47, %v1348_v49 }
 0x172   :  { %v1641_v40 = vpop.f32.mrf.mxu0 }
 0x173   :  { %v4752_v52 = vadd.f32 %v1641_v40, %v1453_v46 }
 0x174   :  { %v1643_v48 = vpop.f32.mrf.mxu0 }
 0x175   :  { %v4750_v50 = vadd.f32 %v1643_v48, %v1454_v42  ;;  %v2034_v42 = vld [vmem:[%s5235_s4] sm:$0xff] }
 0x176   :  { %v1728_v53 = vpop.f32.mrf.mxu1 }
 0x177   :  { %1869 = vmatprep.mubr.f32.mxu1 %v4750_v50  ;;  %v4759_v62 = vadd.f32 %v1728_v53, %v1540_v57 }
 0x178   :  { %v1730_v58 = vpop.f32.mrf.mxu1  ;;  %1870 = vmatmul.mubr.f32.vlgmr.msra.gmra.mxu1 %v4752_v52 }
 0x179   :  { %v4756_v61 = vadd.f32 %v1730_v58, %v1541_v56  ;;  %4068 = vmatpush3.msra.mxu1 %v4270_v33 }
 0x17a   :  { %4069 = vmatprep.subr.mxu1 %v4270_v33 }
 0x17b   :  { %1799 = vmatprep.mubr.f32.mxu0 %v4756_v61  ;;  %4070 = vmatpush3.msra.mxu1 %v4270_v33 }
 0x17c   :  { %1800 = vmatmul.mubr.f32.vlgmr.msra.gmra.mxu0 %v4759_v62  ;;  %4071 = vmatprep.subr.mxu1 %v4270_v33 }
 0x17d   :  { %4033 = vmatpush3.msra.mxu0 %v4270_v33  ;;  %4072 = vmatpush3.msra.mxu1 %v4270_v33 }
 0x17e   :  { %4034 = vmatprep.subr.mxu0 %v4270_v33  ;;  %4073 = vmatprep.subr.mxu1 %v4270_v33 }
 0x17f   :  { %4035 = vmatpush3.msra.mxu0 %v4270_v33  ;;  %4074 = vmatpush3.msra.mxu1 %v4270_v33 }
 0x180   :  { %4036 = vmatprep.subr.mxu0 %v4270_v33  ;;  %4075 = vmatprep.subr.mxu1 %v4270_v33 }
 0x181   :  { %4037 = vmatpush3.msra.mxu0 %v4270_v33  ;;  %4076 = vmatpush3.msra.mxu1 %v4270_v33 }
 0x182   :  { %4038 = vmatprep.subr.mxu0 %v4270_v33  ;;  %4077 = vmatprep.subr.mxu1 %v4270_v33 }
 0x183   :  { %4039 = vmatpush3.msra.mxu0 %v4270_v33  ;;  %4078 = vmatpush3.msra.mxu1 %v4270_v33 }
 0x184   :  { %4040 = vmatprep.subr.mxu0 %v4270_v33  ;;  %4079 = vmatprep.subr.mxu1 %v4270_v33 }
 0x185   :  { %4041 = vmatpush3.msra.mxu0 %v4270_v33  ;;  %4080 = vmatpush3.msra.mxu1 %v4270_v33 }
 0x186   :  { %4042 = vmatprep.subr.mxu0 %v4270_v33  ;;  %4081 = vmatprep.subr.mxu1 %v4270_v33 }
 0x187   :  { %4043 = vmatpush3.msra.mxu0 %v4270_v33  ;;  %4082 = vmatpush3.msra.mxu1 %v4270_v33 }
 0x188   :  { %4044 = vmatprep.subr.mxu0 %v4270_v33  ;;  %4083 = vmatprep.subr.mxu1 %v4270_v33 }
 0x189   :  { %4045 = vmatpush3.msra.mxu0 %v4270_v33  ;;  %4084 = vmatpush3.msra.mxu1 %v4270_v33 }
 0x18a   :  { %4046 = vmatprep.subr.mxu0 %v4270_v33  ;;  %4085 = vmatprep.subr.mxu1 %v4270_v33 }
 0x18b   :  { %4047 = vmatpush3.msra.mxu0 %v4270_v33  ;;  %4086 = vmatpush3.msra.mxu1 %v4270_v33 }
 0x18c   :  { %4048 = vmatprep.subr.mxu0 %v4270_v33  ;;  %4087 = vmatprep.subr.mxu1 %v4270_v33 }
 0x18d   :  { %4049 = vmatpush3.msra.mxu0 %v4270_v33  ;;  %4088 = vmatpush3.msra.mxu1 %v4270_v33 }
 0x18e   :  { %4050 = vmatprep.subr.mxu0 %v4270_v33  ;;  %4089 = vmatprep.subr.mxu1 %v4270_v33 }
 0x18f   :  { %4051 = vmatpush3.msra.mxu0 %v4270_v33  ;;  %4090 = vmatpush3.msra.mxu1 %v4270_v33 }
 0x190   :  { %4052 = vmatprep.subr.mxu0 %v4270_v33  ;;  %4091 = vmatprep.subr.mxu1 %v4270_v33 }
 0x191   :  { %4053 = vmatpush3.msra.mxu0 %v4270_v33  ;;  %4092 = vmatpush3.msra.mxu1 %v4270_v33 }
 0x192   :  { %4054 = vmatprep.subr.mxu0 %v4270_v33  ;;  %4093 = vmatprep.subr.mxu1 %v4270_v33 }
 0x193   :  { %4055 = vmatpush3.msra.mxu0 %v4270_v33  ;;  %4094 = vmatpush3.msra.mxu1 %v4270_v33 }
 0x194   :  { %4056 = vmatprep.subr.mxu0 %v4270_v33  ;;  %4095 = vmatprep.subr.mxu1 %v4270_v33 }
 0x195   :  { %4057 = vmatpush3.msra.mxu0 %v4270_v33  ;;  %4096 = vmatpush3.msra.mxu1 %v4270_v33 }
 0x196   :  { %4058 = vmatprep.subr.mxu0 %v4270_v33  ;;  %4097 = vmatprep.subr.mxu1 %v4270_v33 }
 0x197   :  { %4059 = vmatpush3.msra.mxu0 %v4270_v33  ;;  %4098 = vmatpush3.msra.mxu1 %v4270_v33 }
 0x198   :  { %4060 = vmatprep.subr.mxu0 %v4270_v33 }
 0x199   :  { %4061 = vmatpush3.msra.mxu0 %v4270_v33 }
 0x19a   :  { %4062 = vmatprep.subr.mxu0 %v4270_v33 }
 0x19b   :  { %4063 = vmatpush3.msra.mxu0 %v4270_v33 }
 0x238   :  { %v4029_v5 = vpop.f32.mrf.mxu1 }
 0x23a   :  { %v4030_v6 = vpop.f32.mrf.mxu1 }
 0x23b   :  { %v4031_v12 = vadd.f32 %v4030_v6, %v4029_v5 }
 0x23c   :  { %v3994_v10 = vpop.f32.mrf.mxu0 }
 0x23e   :  { %v3995_v11 = vpop.f32.mrf.mxu0 }
 0x23f   :  { %v3996_v13 = vadd.f32 %v3995_v11, %v3994_v10 }
 0x241   :  { %v1872_v18 = vadd.f32 %v4031_v12, %v3996_v13  ;;  %v2057_v13 = vld [vmem:[%s5236_s5] sm:$0xff] }
 0x243   :  { %v1875_v19 = vmul.f32 0.001953125, %v1872_v18 }
 0x245   :  { %1878 = vperm.xlu0 %4253, %v1875_v19  }
 0x2c0   :  { %v1879_v23 = vpop.permute.xlu0 %1878 }
 0x2c1   :  { %v1881_v25 = vsub.f32 %v4752_v52, %v1879_v23  ;;  %v1882_v26 = vsub.f32 %v4750_v50, %v1879_v23  ;;  %v1883_v27 = vsub.f32 %v4759_v62, %v1879_v23  ;;  %v1884_v8 = vsub.f32 %v4756_v61, %v1879_v23 }
 0x2c3   :  { %v1888_v28 = vmul.f32 %v1884_v8, %v1884_v8  ;;  %v1886_v9 = vmul.f32 %v1882_v26, %v1882_v26  ;;  %v1887_v29 = vmul.f32 %v1883_v27, %v1883_v27  ;;  %v1885_v0 = vmul.f32 %v1881_v25, %v1881_v25 }
 0x2c5   :  { %1953 = vmatprep.mubr.f32.mxu0 %v1888_v28  ;;  %2023 = vmatprep.mubr.f32.mxu1 %v1886_v9 }
 0x2c6   :  { %1954 = vmatmul.mubr.f32.vlgmr.msra.gmra.mxu0 %v1887_v29  ;;  %2024 = vmatmul.mubr.f32.vlgmr.msra.gmra.mxu1 %v1885_v0 }
 0x2c7   :  { %2226 = vmatprep.mubr.f32.mxu1 %v4261_v1  ;;  %2152 = vmatprep.mubr.f32.mxu0 %v4261_v1 }
 0x386   :  { %v4064_v2 = vpop.f32.mrf.mxu0  ;;  %v4099_v30 = vpop.f32.mrf.mxu1 }
 0x388   :  { %v4065_v31 = vpop.f32.mrf.mxu0  ;;  %v4100_v32 = vpop.f32.mrf.mxu1 }
 0x389   :  { %v4066_v34 = vadd.f32 %v4065_v31, %v4064_v2  ;;  %v4101_v35 = vadd.f32 %v4100_v32, %v4099_v30 }
 0x38b   :  { %v2026_v36 = vadd.f32 %v4101_v35, %v4066_v34 }
 0x38d   :  { %v2029_v37 = vmul.f32 0.001953125, %v2026_v36 }
 0x38f   :  { %v2031_v38 = vadd.f32 1e-05, %v2029_v37 }
 0x391   :  { %4257 = vrsqrt.f32 %v2031_v38 }
 0x39e   :  { %v4258_v40 = vpop.eup %4257 }
 0x39f   :  { %v2033_v41 = vmul.f32 %v4258_v40, %v2030_v39 }
 0x3a1   :  { %2037 = vperm.xlu1 %4254, %v2033_v41  }
 0x3a5   :  { %2044 = vperm.xlu1 %4254, %v2034_v42  }
 0x41c   :  { %v2038_v45 = vpop.permute.xlu1 %2037 }
 0x41d   :  { %v2040_v46 = vmul.f32 %v2038_v45, %v1881_v25  ;;  %v2041_v47 = vmul.f32 %v2038_v45, %v1882_v26  ;;  %v2051_v53 = vmul.f32 %v2038_v45, %v1883_v27  ;;  %v2052_v56 = vmul.f32 %v2038_v45, %v1884_v8  ;;  %v3936_v8 = vld [vmem:[%s5236_s5 + $0x8] sm:$0xff] }
 0x420   :  { %v2045_v48 = vpop.permute.xlu1 %2044 }
 0x421   :  { %v2047_v49 = vadd.f32 %v2045_v48, %v2040_v46  ;;  %v2048_v50 = vadd.f32 %v2045_v48, %v2041_v47  ;;  %v2053_v57 = vadd.f32 %v2051_v53, %v2045_v48  ;;  %v2054_v58 = vadd.f32 %v2052_v56, %v2045_v48 }
 0x423   :  { %v4836_v51 = vmax.f32 %v2047_v49, 0.0  ;;  %v4838_v52 = vmax.f32 %v2048_v50, 0.0  ;;  %v4848_v61 = vmax.f32 %v2053_v57, 0.0  ;;  %v4850_v62 = vmax.f32 %v2054_v58, 0.0 }
 0x425   :  { %2060 = vrot.lane.b32.xlu1 %v4838_v52, %s4263_s30  ;;  %2058 = vrot.lane.b32.xlu0 %v4836_v51, %s4263_s30 }
 0x429   :  { %2078 = vrot.lane.b32.xlu1 %v4838_v52, %s4262_s29  ;;  %2076 = vrot.lane.b32.xlu0 %v4836_v51, %s4262_s29 }
 0x42d   :  { %2068 = vrot.lane.b32.xlu1 %v4850_v62, %s4263_s30  ;;  %2066 = vrot.lane.b32.xlu0 %v4848_v61, %s4263_s30 }
 0x431   :  { %2235 = vrot.lane.b32.xlu1 %v4850_v62, %s4262_s29  ;;  %2233 = vrot.lane.b32.xlu0 %v4848_v61, %s4262_s29 }
 0x435   :  { %2387 = vrot.lane.b32.xlu1 %v4838_v52, %s4264_s1  ;;  %2385 = vrot.lane.b32.xlu0 %v4836_v51, %s4264_s1 }
 0x439   :  { %2471 = vrot.lane.b32.xlu1 %v4850_v62, %s4264_s1  ;;  %2469 = vrot.lane.b32.xlu0 %v4848_v61, %s4264_s1 }
 0x43d   :  { %2554 = vrot.lane.b32.xlu1 %v4838_v52, %s4265_s11  ;;  %2552 = vrot.lane.b32.xlu0 %v4836_v51, %s4265_s11 }
 0x441   :  { %2638 = vrot.lane.b32.xlu1 %v4850_v62, %s4265_s11  ;;  %2636 = vrot.lane.b32.xlu0 %v4848_v61, %s4265_s11 }
 0x445   :  { %2872 = vrot.lane.b32.xlu1 %v4838_v52, %s4266_s12  ;;  %2870 = vrot.lane.b32.xlu0 %v4836_v51, %s4266_s12 }
 0x449   :  { %2956 = vrot.lane.b32.xlu1 %v4850_v62, %s4266_s12  ;;  %2954 = vrot.lane.b32.xlu0 %v4848_v61, %s4266_s12 }
 0x44d   :  { %3039 = vrot.lane.b32.xlu1 %v4838_v52, %s4267_s13  ;;  %3037 = vrot.lane.b32.xlu0 %v4836_v51, %s4267_s13 }
 0x451   :  { %3123 = vrot.lane.b32.xlu1 %v4850_v62, %s4267_s13  ;;  %3121 = vrot.lane.b32.xlu0 %v4848_v61, %s4267_s13 }
 0x455   :  { %3206 = vrot.lane.b32.xlu1 %v4838_v52, %s4268_s14  ;;  %3204 = vrot.lane.b32.xlu0 %v4836_v51, %s4268_s14 }
 0x459   :  { %3290 = vrot.lane.b32.xlu1 %v4850_v62, %s4268_s14  ;;  %3288 = vrot.lane.b32.xlu0 %v4848_v61, %s4268_s14 }
 0x45d   :  { %3373 = vrot.lane.b32.xlu1 %v4838_v52, %s4269_s15  ;;  %3371 = vrot.lane.b32.xlu0 %v4836_v51, %s4269_s15 }
 0x461   :  { %3457 = vrot.lane.b32.xlu1 %v4850_v62, %s4269_s15  ;;  %3455 = vrot.lane.b32.xlu0 %v4848_v61, %s4269_s15 }
 0x497   :  { %v2061_v63 = vpop.permute.xlu1 %2060  ;;  %v2059_v5 = vpop.permute.xlu0 %2058 }
 0x498   :  { %v2062_v6 = vsel %vm43_vm1, %v2059_v5, %v2061_v63  ;;  %v2063_v10 = vsel %vm43_vm1, %v2061_v63, %v2059_v5 }
 0x499   :  { %v2064_v11 = vmul.f32 %v2063_v10, %v4419_v15  ;;  %v2065_v12 = vmul.f32 %v2062_v6, %v4422_v16 }
 0x49b   :  { %v2079_v18 = vpop.permute.xlu1 %2078  ;;  %2192 = vmatprep.subr.mxu1 %v2065_v12  ;;  %v2077_v19 = vpop.permute.xlu0 %2076 }
 0x49c   :  { %v2080_v23 = vsel %vm78_vm0, %v2077_v19, %v2079_v18  ;;  %v2081_v25 = vsel %vm78_vm0, %v2079_v18, %v2077_v19  ;;  %2193 = vmatpush1.msra.mxu1 %v2064_v11  ;;  %v3947_v18 = vld [vmem:[%s5236_s5 + $0x20] sm:$0xff] }
 0x49d   :  { %v2082_v26 = vmul.f32 %v2081_v25, %v4416_v14  ;;  %v2083_v27 = vmul.f32 %v2080_v23, %v4425_v17  ;;  %3938 = vmatmul.mubr.msk.f32.vlgmr.msra.gmra.mxu1 %vm2084_vm10, %v2057_v13  ;;  %v3950_v25 = vld [vmem:[%s5236_s5 + $0x28] sm:$0xff] }
 0x49e   :  { %2376 = vmatprep.mubr.f32.mxu1 %v4261_v1 }
 0x49f   :  { %2118 = vmatprep.subr.mxu0 %v2083_v27  ;;  %v2069_v28 = vpop.permute.xlu1 %2068  ;;  %v2067_v9 = vpop.permute.xlu0 %2066 }
 0x4a0   :  { %v2070_v29 = vsel %vm43_vm1, %v2067_v9, %v2069_v28  ;;  %v2071_v0 = vsel %vm43_vm1, %v2069_v28, %v2067_v9  ;;  %2119 = vmatpush1.msra.mxu0 %v2082_v26 }
 0x4a1   :  { %v2072_v2 = vmul.f32 %v2071_v0, %v4419_v15  ;;  %v2073_v30 = vmul.f32 %v2070_v29, %v4422_v16  ;;  %3937 = vmatmul.mubr.msk.f32.vlgmr.msra.gmra.mxu0 %vm2084_vm10, %v3936_v8  ;;  %v3953_v0 = vld [vmem:[%s5236_s5 + $0x30] sm:$0xff] }
 0x4a2   :  { %2305 = vmatprep.mubr.f32.mxu0 %v4261_v1 }
 0x4a3   :  { %v2236_v31 = vpop.permute.xlu1 %2235  ;;  %2342 = vmatprep.subr.mxu1 %v2073_v30  ;;  %v2234_v32 = vpop.permute.xlu0 %2233 }
 0x4a4   :  { %v2237_v34 = vsel %vm78_vm0, %v2234_v32, %v2236_v31  ;;  %v2238_v35 = vsel %vm78_vm0, %v2236_v31, %v2234_v32  ;;  %2343 = vmatpush1.msra.mxu1 %v2072_v2 }
 0x4a5   :  { %v2239_v36 = vmul.f32 %v2238_v35, %v4416_v14  ;;  %v2240_v15 = vmul.f32 %v2237_v34, %v4425_v17  ;;  %3940 = vmatmul.mubr.msk.f32.vlgmr.msra.gmra.mxu1 %vm2084_vm10, %v2057_v13  ;;  %v3941_v17 = vld [vmem:[%s5236_s5 + $0x10] sm:$0xff] }
 0x4a6   :  { %2541 = vmatprep.mubr.f32.mxu1 %v4261_v1 }
 0x4a7   :  { %v2388_v16 = vpop.permute.xlu1 %2387  ;;  %2271 = vmatprep.subr.mxu0 %v2240_v15  ;;  %v2386_v37 = vpop.permute.xlu0 %2385 }
 0x4a8   :  { %v2389_v38 = vsel %vm426_vm4, %v2386_v37, %v2388_v16  ;;  %v2390_v39 = vsel %vm426_vm4, %v2388_v16, %v2386_v37  ;;  %2272 = vmatpush1.msra.mxu0 %v2239_v36 }
 0x4a9   :  { %v2391_v40 = vmul.f32 %v2390_v39, %v4472_v43  ;;  %v2392_v14 = vmul.f32 %v2389_v38, %v4475_v44  ;;  %3939 = vmatmul.mubr.msk.f32.vlgmr.msra.gmra.mxu0 %vm2084_vm10, %v3936_v8 }
 0x4aa   :  { %2460 = vmatprep.mubr.f32.mxu0 %v4261_v1 }
 0x4ab   :  { %v2472_v41 = vpop.permute.xlu1 %2471  ;;  %2426 = vmatprep.subr.mxu0 %v2392_v14  ;;  %v2470_v42 = vpop.permute.xlu0 %2469 }
 0x4ac   :  { %v2473_v45 = vsel %vm426_vm4, %v2470_v42, %v2472_v41  ;;  %v2474_v46 = vsel %vm426_vm4, %v2472_v41, %v2470_v42  ;;  %2427 = vmatpush1.msra.mxu0 %v2391_v40 }
 0x4ad   :  { %v2475_v47 = vmul.f32 %v2474_v46, %v4472_v43  ;;  %v2476_v48 = vmul.f32 %v2473_v45, %v4475_v44  ;;  %3942 = vmatmul.mubr.msk.f32.vlgmr.msra.gmra.mxu0 %vm2084_vm10, %v3941_v17  ;;  %v3944_v44 = vld [vmem:[%s5236_s5 + $0x18] sm:$0xff] }
 0x4ae   :  { %2627 = vmatprep.mubr.f32.mxu0 %v4261_v1 }
 0x4af   :  { %v2555_v49 = vpop.permute.xlu1 %2554  ;;  %2507 = vmatprep.subr.mxu1 %v2476_v48  ;;  %v2553_v50 = vpop.permute.xlu0 %2552 }
 0x4b0   :  { %v2556_v53 = vsel %vm619_vm5, %v2553_v50, %v2555_v49  ;;  %v2557_v56 = vsel %vm619_vm5, %v2555_v49, %v2553_v50  ;;  %2508 = vmatpush1.msra.mxu1 %v2475_v47 }
 0x4b1   :  { %v2558_v57 = vmul.f32 %v2557_v56, %v4505_v59  ;;  %v2559_v43 = vmul.f32 %v2556_v53, %v4508_v60  ;;  %3943 = vmatmul.mubr.msk.f32.vlgmr.msra.gmra.mxu1 %vm2084_vm10, %v3941_v17 }
 0x4b2   :  { %2708 = vmatprep.mubr.f32.mxu1 %v4261_v1 }
 0x4b3   :  { %v2639_v58 = vpop.permute.xlu1 %2638  ;;  %2593 = vmatprep.subr.mxu0 %v2559_v43  ;;  %v2637_v63 = vpop.permute.xlu0 %2636 }
 0x4b4   :  { %v2640_v5 = vsel %vm619_vm5, %v2637_v63, %v2639_v58  ;;  %v2641_v6 = vsel %vm619_vm5, %v2639_v58, %v2637_v63  ;;  %2594 = vmatpush1.msra.mxu0 %v2558_v57 }
 0x4b5   :  { %v2642_v10 = vmul.f32 %v2641_v6, %v4505_v59  ;;  %v2643_v11 = vmul.f32 %v2640_v5, %v4508_v60  ;;  %2752 = vmatprep.subr.mxu0 %v4838_v52  ;;  %3945 = vmatmul.mubr.msk.f32.vlgmr.msra.gmra.mxu0 %vm2084_vm10, %v3944_v44 }
 0x4b6   :  { %2753 = vmatpush1.msra.mxu0 %v4836_v51  ;;  %2786 = vmatprep.mubr.f32.mxu0 %v4261_v1 }
 0x4b7   :  { %v2873_v12 = vpop.permute.xlu1 %2872  ;;  %2674 = vmatprep.subr.mxu1 %v2643_v11  ;;  %v2871_v13 = vpop.permute.xlu0 %2870 }
 0x4b8   :  { %v2874_v59 = vsel %vm971_vm6, %v2871_v13, %v2873_v12  ;;  %v2875_v60 = vsel %vm971_vm6, %v2873_v12, %v2871_v13  ;;  %2675 = vmatpush1.msra.mxu1 %v2642_v10 }
 0x4b9   :  { %v2876_v52 = vmul.f32 %v2874_v59, %v4535_v21  ;;  %v2877_v51 = vmul.f32 %v2875_v60, %v4541_v24  ;;  %2825 = vmatprep.subr.mxu1 %v4850_v62  ;;  %3946 = vmatmul.mubr.msk.f32.vlgmr.msra.gmra.mxu1 %vm2084_vm10, %v3944_v44 }
 0x4ba   :  { %2826 = vmatpush1.msra.mxu1 %v4848_v61  ;;  %3948 = vmatmul.mubr.msk.f32.vlgmr.msra.gmra.mxu0 %vm2084_vm10, %v3947_v18 }
 0x4bb   :  { %v2957_v19 = vpop.permute.xlu1 %2956  ;;  %2911 = vmatprep.subr.mxu0 %v2877_v51  ;;  %v2955_v23 = vpop.permute.xlu0 %2954  ;;  %2859 = vmatprep.mubr.f32.mxu1 %v4261_v1 }
 0x4bc   :  { %v2958_v26 = vsel %vm971_vm6, %v2955_v23, %v2957_v19  ;;  %v2959_v62 = vsel %vm971_vm6, %v2957_v19, %v2955_v23  ;;  %2912 = vmatpush1.msra.mxu0 %v2876_v52  ;;  %2945 = vmatprep.mubr.f32.mxu0 %v4261_v1 }
 0x4bd   :  { %v2960_v61 = vmul.f32 %v2958_v26, %v4535_v21  ;;  %v2961_v27 = vmul.f32 %v2959_v62, %v4541_v24  ;;  %3949 = vmatmul.mubr.msk.f32.vlgmr.msra.gmra.mxu1 %vm2084_vm10, %v3947_v18 }
 0x4be   :  { %3951 = vmatmul.mubr.msk.f32.vlgmr.msra.gmra.mxu0 %vm2084_vm10, %v3950_v25  ;;  %3026 = vmatprep.mubr.f32.mxu1 %v4261_v1 }
 0x4bf   :  { %v3040_v8 = vpop.permute.xlu1 %3039  ;;  %2992 = vmatprep.subr.mxu1 %v2961_v27  ;;  %v3038_v28 = vpop.permute.xlu0 %3037  ;;  %3112 = vmatprep.mubr.f32.mxu0 %v4261_v1 }
 0x4c0   :  { %v3041_v9 = vsel %vm1164_vm7, %v3038_v28, %v3040_v8  ;;  %v3042_v29 = vsel %vm1164_vm7, %v3040_v8, %v3038_v28  ;;  %2993 = vmatpush1.msra.mxu1 %v2960_v61 }
 0x4c1   :  { %v3043_v21 = vmul.f32 %v3041_v9, %v4581_v4  ;;  %v3044_v24 = vmul.f32 %v3042_v29, %v4587_v3  ;;  %3952 = vmatmul.mubr.msk.f32.vlgmr.msra.gmra.mxu1 %vm2084_vm10, %v3950_v25 }
 0x4c2   :  { %3193 = vmatprep.mubr.f32.mxu1 %v4261_v1 }
 0x4c3   :  { %v3124_v2 = vpop.permute.xlu1 %3123  ;;  %3078 = vmatprep.subr.mxu0 %v3044_v24  ;;  %v3122_v30 = vpop.permute.xlu0 %3121 }
 0x4c4   :  { %v3125_v31 = vsel %vm1164_vm7, %v3122_v30, %v3124_v2  ;;  %v3126_v32 = vsel %vm1164_vm7, %v3124_v2, %v3122_v30  ;;  %3079 = vmatpush1.msra.mxu0 %v3043_v21 }
 0x4c5   :  { %v3127_v34 = vmul.f32 %v3125_v31, %v4581_v4  ;;  %v3128_v35 = vmul.f32 %v3126_v32, %v4587_v3  ;;  %3954 = vmatmul.mubr.msk.f32.vlgmr.msra.gmra.mxu0 %vm2084_vm10, %v3953_v0  ;;  %v3956_v3 = vld [vmem:[%s5236_s5 + $0x38] sm:$0xff] }
 0x4c6   :  { %3279 = vmatprep.mubr.f32.mxu0 %v4261_v1 }
 0x4c7   :  { %v3207_v36 = vpop.permute.xlu1 %3206  ;;  %3159 = vmatprep.subr.mxu1 %v3128_v35  ;;  %v3205_v15 = vpop.permute.xlu0 %3204 }
 0x4c8   :  { %v3208_v16 = vsel %vm1357_vm8, %v3205_v15, %v3207_v36  ;;  %v3209_v37 = vsel %vm1357_vm8, %v3207_v36, %v3205_v15  ;;  %3160 = vmatpush1.msra.mxu1 %v3127_v34 }
 0x4c9   :  { %v3210_v38 = vmul.f32 %v3208_v16, %v4620_v54  ;;  %v3211_v4 = vmul.f32 %v3209_v37, %v4623_v55  ;;  %3955 = vmatmul.mubr.msk.f32.vlgmr.msra.gmra.mxu1 %vm2084_vm10, %v3953_v0 }
 0x4ca   :  { %3360 = vmatprep.mubr.f32.mxu1 %v4261_v1 }
 0x4cb   :  { %v3291_v39 = vpop.permute.xlu1 %3290  ;;  %3245 = vmatprep.subr.mxu0 %v3211_v4  ;;  %v3289_v40 = vpop.permute.xlu0 %3288 }
 0x4cc   :  { %v3292_v14 = vsel %vm1357_vm8, %v3289_v40, %v3291_v39  ;;  %v3293_v17 = vsel %vm1357_vm8, %v3291_v39, %v3289_v40  ;;  %3246 = vmatpush1.msra.mxu0 %v3210_v38 }
 0x4cd   :  { %v3294_v41 = vmul.f32 %v3292_v14, %v4620_v54  ;;  %v3295_v42 = vmul.f32 %v3293_v17, %v4623_v55  ;;  %3957 = vmatmul.mubr.msk.f32.vlgmr.msra.gmra.mxu0 %vm2084_vm10, %v3956_v3  ;;  %v3959_v55 = vld [vmem:[%s5236_s5 + $0x40] sm:$0xff] }
 0x4ce   :  { %3446 = vmatprep.mubr.f32.mxu0 %v4261_v1 }
 0x4cf   :  { %v3374_v45 = vpop.permute.xlu1 %3373  ;;  %3326 = vmatprep.subr.mxu1 %v3295_v42  ;;  %v3372_v46 = vpop.permute.xlu0 %3371 }
 0x4d0   :  { %v3375_v47 = vsel %vm1550_vm9, %v3372_v46, %v3374_v45  ;;  %v3376_v48 = vsel %vm1550_vm9, %v3374_v45, %v3372_v46  ;;  %3327 = vmatpush1.msra.mxu1 %v3294_v41 }
 0x4d1   :  { %v3377_v49 = vmul.f32 %v3375_v47, %v4653_v20  ;;  %v3378_v54 = vmul.f32 %v3376_v48, %v4656_v22  ;;  %3958 = vmatmul.mubr.msk.f32.vlgmr.msra.gmra.mxu1 %vm2084_vm10, %v3956_v3 }
 0x4d2   :  { %3527 = vmatprep.mubr.f32.mxu1 %v4261_v1 }
 0x4d3   :  { %v3458_v50 = vpop.permute.xlu1 %3457  ;;  %3412 = vmatprep.subr.mxu0 %v3378_v54  ;;  %v3456_v53 = vpop.permute.xlu0 %3455 }
 0x4d4   :  { %v3459_v56 = vsel %vm1550_vm9, %v3456_v53, %v3458_v50  ;;  %v3460_v57 = vsel %vm1550_vm9, %v3458_v50, %v3456_v53  ;;  %3413 = vmatpush1.msra.mxu0 %v3377_v49 }
 0x4d5   :  { %v3461_v43 = vmul.f32 %v3459_v56, %v4653_v20  ;;  %v3462_v44 = vmul.f32 %v3460_v57, %v4656_v22  ;;  %3960 = vmatmul.mubr.msk.f32.vlgmr.msra.gmra.mxu0 %vm2084_vm10, %v3959_v55  ;;  %4102 = vmatprep.subr.mxu0 %v4270_v33 }
 0x4d6   :  { %4103 = vmatpush3.msra.mxu0 %v4270_v33 }
 0x4d7   :  { %3493 = vmatprep.subr.mxu1 %v3462_v44  ;;  %4104 = vmatprep.subr.mxu0 %v4270_v33 }
 0x4d8   :  { %3494 = vmatpush1.msra.mxu1 %v3461_v43  ;;  %4105 = vmatpush3.msra.mxu0 %v4270_v33 }
 0x4d9   :  { %3961 = vmatmul.mubr.msk.f32.vlgmr.msra.gmra.mxu1 %vm2084_vm10, %v3959_v55  ;;  %4137 = vmatprep.subr.mxu1 %v4270_v33 }
 0x4da   :  { %4138 = vmatpush3.msra.mxu1 %v4270_v33  ;;  %4106 = vmatprep.subr.mxu0 %v4270_v33 }
 0x4db   :  { %4139 = vmatprep.subr.mxu1 %v4270_v33  ;;  %4107 = vmatpush3.msra.mxu0 %v4270_v33 }
 0x4dc   :  { %4140 = vmatpush3.msra.mxu1 %v4270_v33  ;;  %4108 = vmatprep.subr.mxu0 %v4270_v33 }
 0x4dd   :  { %4141 = vmatprep.subr.mxu1 %v4270_v33  ;;  %4109 = vmatpush3.msra.mxu0 %v4270_v33 }
 0x4de   :  { %4142 = vmatpush3.msra.mxu1 %v4270_v33  ;;  %4110 = vmatprep.subr.mxu0 %v4270_v33 }
 0x4df   :  { %4143 = vmatprep.subr.mxu1 %v4270_v33  ;;  %4111 = vmatpush3.msra.mxu0 %v4270_v33 }
 0x4e0   :  { %4144 = vmatpush3.msra.mxu1 %v4270_v33  ;;  %4112 = vmatprep.subr.mxu0 %v4270_v33 }
 0x4e1   :  { %4145 = vmatprep.subr.mxu1 %v4270_v33  ;;  %4113 = vmatpush3.msra.mxu0 %v4270_v33 }
 0x4e2   :  { %4146 = vmatpush3.msra.mxu1 %v4270_v33  ;;  %4114 = vmatprep.subr.mxu0 %v4270_v33 }
 0x4e3   :  { %4147 = vmatprep.subr.mxu1 %v4270_v33  ;;  %4115 = vmatpush3.msra.mxu0 %v4270_v33 }
 0x4e4   :  { %4148 = vmatpush3.msra.mxu1 %v4270_v33  ;;  %4116 = vmatprep.subr.mxu0 %v4270_v33 }
 0x4e5   :  { %4149 = vmatprep.subr.mxu1 %v4270_v33  ;;  %4117 = vmatpush3.msra.mxu0 %v4270_v33 }
 0x4e6   :  { %4150 = vmatpush3.msra.mxu1 %v4270_v33  ;;  %4118 = vmatprep.subr.mxu0 %v4270_v33 }
 0x4e7   :  { %4151 = vmatprep.subr.mxu1 %v4270_v33  ;;  %4119 = vmatpush3.msra.mxu0 %v4270_v33 }
 0x4e8   :  { %4152 = vmatpush3.msra.mxu1 %v4270_v33  ;;  %4120 = vmatprep.subr.mxu0 %v4270_v33 }
 0x4e9   :  { %4153 = vmatprep.subr.mxu1 %v4270_v33  ;;  %4121 = vmatpush3.msra.mxu0 %v4270_v33 }
 0x4ea   :  { %4154 = vmatpush3.msra.mxu1 %v4270_v33  ;;  %4122 = vmatprep.subr.mxu0 %v4270_v33 }
 0x4eb   :  { %4155 = vmatprep.subr.mxu1 %v4270_v33  ;;  %4123 = vmatpush3.msra.mxu0 %v4270_v33 }
 0x4ec   :  { %4156 = vmatpush3.msra.mxu1 %v4270_v33  ;;  %4124 = vmatprep.subr.mxu0 %v4270_v33 }
 0x4ed   :  { %4157 = vmatprep.subr.mxu1 %v4270_v33  ;;  %4125 = vmatpush3.msra.mxu0 %v4270_v33 }
 0x4ee   :  { %4158 = vmatpush3.msra.mxu1 %v4270_v33  ;;  %4126 = vmatprep.subr.mxu0 %v4270_v33 }
 0x4ef   :  { %4159 = vmatprep.subr.mxu1 %v4270_v33  ;;  %4127 = vmatpush3.msra.mxu0 %v4270_v33 }
 0x4f0   :  { %4160 = vmatpush3.msra.mxu1 %v4270_v33  ;;  %4128 = vmatprep.subr.mxu0 %v4270_v33 }
 0x4f1   :  { %4161 = vmatprep.subr.mxu1 %v4270_v33  ;;  %4129 = vmatpush3.msra.mxu0 %v4270_v33 }
 0x4f2   :  { %4162 = vmatpush3.msra.mxu1 %v4270_v33  ;;  %4130 = vmatprep.subr.mxu0 %v4270_v33 }
 0x4f3   :  { %4163 = vmatprep.subr.mxu1 %v4270_v33  ;;  %4131 = vmatpush3.msra.mxu0 %v4270_v33 }
 0x4f4   :  { %4164 = vmatpush3.msra.mxu1 %v4270_v33  ;;  %4132 = vmatprep.subr.mxu0 %v4270_v33 }
 0x4f5   :  { %4165 = vmatprep.subr.mxu1 %v4270_v33  ;;  %4133 = vmatpush3.msra.mxu0 %v4270_v33 }
 0x4f6   :  { %4166 = vmatpush3.msra.mxu1 %v4270_v33  ;;  %4172 = vmatprep.subr.mxu0 %v4270_v33 }
 0x4f7   :  { %4167 = vmatprep.subr.mxu1 %v4270_v33 }
 0x4f8   :  { %4168 = vmatpush3.msra.mxu1 %v4270_v33 }
 0x4f9   :  { %4207 = vmatprep.subr.mxu1 %v4270_v33 }
 0x55d   :  { %v2228_v7 = vpop.f32.mrf.mxu1 }
 0x55f   :  { %v2230_v22 = vpop.f32.mrf.mxu1 }
 0x561   :  { %v2154_v1 = vpop.f32.mrf.mxu0 }
 0x562   :  { %v2229_v26 = vadd.f32 %v2228_v7, %v2154_v1 }
 0x563   :  { %v2156_v20 = vpop.f32.mrf.mxu0 }
 0x564   :  { %v2231_v25 = vadd.f32 %v2230_v22, %v2156_v20 }
 0x565   :  { %v2378_v63 = vpop.f32.mrf.mxu1 }
 0x567   :  { %v2380_v10 = vpop.f32.mrf.mxu1 }
 0x569   :  { %v2307_v58 = vpop.f32.mrf.mxu0 }
 0x56a   :  { %v2379_v28 = vadd.f32 %v2378_v63, %v2307_v58 }
 0x56b   :  { %v2309_v5 = vpop.f32.mrf.mxu0 }
 0x56c   :  { %v2381_v27 = vadd.f32 %v2380_v10, %v2309_v5 }
 0x56d   :  { %v2462_v6 = vpop.f32.mrf.mxu0 }
 0x56e   :  { %v2467_v9 = vadd.f32 %v2462_v6, %v2229_v26 }
 0x56f   :  { %v2464_v11 = vpop.f32.mrf.mxu0 }
 0x570   :  { %v2468_v8 = vadd.f32 %v2464_v11, %v2231_v25 }
 0x571   :  { %v2543_v12 = vpop.f32.mrf.mxu1 }
 0x572   :  { %v2548_v30 = vadd.f32 %v2543_v12, %v2379_v28 }
 0x573   :  { %v2545_v18 = vpop.f32.mrf.mxu1 }
 0x574   :  { %v2549_v0 = vadd.f32 %v2545_v18, %v2381_v27 }
 0x575   :  { %v2629_v13 = vpop.f32.mrf.mxu0 }
 0x576   :  { %v2634_v31 = vadd.f32 %v2629_v13, %v2467_v9 }
 0x577   :  { %v2631_v59 = vpop.f32.mrf.mxu0 }
 0x578   :  { %v2635_v2 = vadd.f32 %v2631_v59, %v2468_v8  ;;  %v3835_v59 = vld [vmem:[%s5237_s7] sm:$0xff] }
 0x579   :  { %v2710_v60 = vpop.f32.mrf.mxu1 }
 0x57a   :  { %v2788_v52 = vpop.f32.mrf.mxu0  ;;  %v2715_v16 = vadd.f32 %v2710_v60, %v2548_v30 }
 0x57b   :  { %v2712_v51 = vpop.f32.mrf.mxu1  ;;  %v2793_v37 = vadd.f32 %v2788_v52, %v2634_v31 }
 0x57c   :  { %v2790_v19 = vpop.f32.mrf.mxu0  ;;  %v2716_v36 = vadd.f32 %v2712_v51, %v2549_v0 }
 0x57d   :  { %v2861_v23 = vpop.f32.mrf.mxu1  ;;  %v2794_v15 = vadd.f32 %v2790_v19, %v2635_v2  ;;  %v3831_v2 = vld [vmem:[%s5238_s6] sm:$0xff] }
 0x57e   :  { %v2947_v62 = vpop.f32.mrf.mxu0  ;;  %v2866_v40 = vadd.f32 %v2861_v23, %v2715_v16 }
 0x57f   :  { %v2863_v61 = vpop.f32.mrf.mxu1  ;;  %v2952_v14 = vadd.f32 %v2947_v62, %v2793_v37 }
 0x580   :  { %v2949_v29 = vpop.f32.mrf.mxu0  ;;  %v2867_v3 = vadd.f32 %v2863_v61, %v2716_v36 }
 0x581   :  { %v3028_v21 = vpop.f32.mrf.mxu1  ;;  %v2953_v39 = vadd.f32 %v2949_v29, %v2794_v15 }
 0x582   :  { %v3033_v49 = vadd.f32 %v3028_v21, %v2866_v40 }
 0x583   :  { %v3030_v32 = vpop.f32.mrf.mxu1 }
 0x584   :  { %v3034_v47 = vadd.f32 %v3030_v32, %v2867_v3 }
 0x585   :  { %v3114_v24 = vpop.f32.mrf.mxu0 }
 0x586   :  { %v3119_v45 = vadd.f32 %v3114_v24, %v2952_v14 }
 0x587   :  { %v3116_v34 = vpop.f32.mrf.mxu0 }
 0x588   :  { %v3120_v42 = vadd.f32 %v3116_v34, %v2953_v39 }
 0x589   :  { %v3195_v35 = vpop.f32.mrf.mxu1 }
 0x58a   :  { %v3200_v57 = vadd.f32 %v3195_v35, %v3033_v49 }
 0x58b   :  { %v3197_v4 = vpop.f32.mrf.mxu1 }
 0x58c   :  { %v3201_v53 = vadd.f32 %v3197_v4, %v3034_v47 }
 0x58d   :  { %v3281_v38 = vpop.f32.mrf.mxu0 }
 0x58e   :  { %v3286_v54 = vadd.f32 %v3281_v38, %v3119_v45 }
 0x58f   :  { %v3283_v17 = vpop.f32.mrf.mxu0 }
 0x590   :  { %v3287_v48 = vadd.f32 %v3283_v17, %v3120_v42 }
 0x591   :  { %v3362_v41 = vpop.f32.mrf.mxu1 }
 0x592   :  { %v3367_v7 = vadd.f32 %v3362_v41, %v3200_v57 }
 0x593   :  { %v3364_v55 = vpop.f32.mrf.mxu1 }
 0x594   :  { %v3368_v1 = vadd.f32 %v3364_v55, %v3201_v53 }
 0x595   :  { %v3448_v46 = vpop.f32.mrf.mxu0 }
 0x596   :  { %v5137_v43 = vadd.f32 %v3448_v46, %v3286_v54 }
 0x597   :  { %v3450_v50 = vpop.f32.mrf.mxu0 }
 0x598   :  { %v5135_v56 = vadd.f32 %v3450_v50, %v3287_v48 }
 0x599   :  { %v3529_v44 = vpop.f32.mrf.mxu1 }
 0x59a   :  { %3670 = vmatprep.mubr.f32.mxu1 %v5135_v56  ;;  %v5144_v58 = vadd.f32 %v3529_v44, %v3367_v7 }
 0x59b   :  { %v3531_v20 = vpop.f32.mrf.mxu1  ;;  %3671 = vmatmul.mubr.f32.vlgmr.msra.gmra.mxu1 %v5137_v43 }
 0x59c   :  { %v5141_v22 = vadd.f32 %v3531_v20, %v3368_v1  ;;  %4208 = vmatpush3.msra.mxu1 %v4270_v33 }
 0x59d   :  { %4209 = vmatprep.subr.mxu1 %v4270_v33 }
 0x59e   :  { %3600 = vmatprep.mubr.f32.mxu0 %v5141_v22  ;;  %4210 = vmatpush3.msra.mxu1 %v4270_v33 }
 0x59f   :  { %3601 = vmatmul.mubr.f32.vlgmr.msra.gmra.mxu0 %v5144_v58  ;;  %4211 = vmatprep.subr.mxu1 %v4270_v33 }
 0x5a0   :  { %4173 = vmatpush3.msra.mxu0 %v4270_v33  ;;  %4212 = vmatpush3.msra.mxu1 %v4270_v33 }
 0x5a1   :  { %4174 = vmatprep.subr.mxu0 %v4270_v33  ;;  %4213 = vmatprep.subr.mxu1 %v4270_v33 }
 0x5a2   :  { %4175 = vmatpush3.msra.mxu0 %v4270_v33  ;;  %4214 = vmatpush3.msra.mxu1 %v4270_v33 }
 0x5a3   :  { %4176 = vmatprep.subr.mxu0 %v4270_v33  ;;  %4215 = vmatprep.subr.mxu1 %v4270_v33 }
 0x5a4   :  { %4177 = vmatpush3.msra.mxu0 %v4270_v33  ;;  %4216 = vmatpush3.msra.mxu1 %v4270_v33 }
 0x5a5   :  { %4178 = vmatprep.subr.mxu0 %v4270_v33  ;;  %4217 = vmatprep.subr.mxu1 %v4270_v33 }
 0x5a6   :  { %4179 = vmatpush3.msra.mxu0 %v4270_v33  ;;  %4218 = vmatpush3.msra.mxu1 %v4270_v33 }
 0x5a7   :  { %4180 = vmatprep.subr.mxu0 %v4270_v33  ;;  %4219 = vmatprep.subr.mxu1 %v4270_v33 }
 0x5a8   :  { %4181 = vmatpush3.msra.mxu0 %v4270_v33  ;;  %4220 = vmatpush3.msra.mxu1 %v4270_v33 }
 0x5a9   :  { %4182 = vmatprep.subr.mxu0 %v4270_v33  ;;  %4221 = vmatprep.subr.mxu1 %v4270_v33 }
 0x5aa   :  { %4183 = vmatpush3.msra.mxu0 %v4270_v33  ;;  %4222 = vmatpush3.msra.mxu1 %v4270_v33 }
 0x5ab   :  { %4184 = vmatprep.subr.mxu0 %v4270_v33  ;;  %4223 = vmatprep.subr.mxu1 %v4270_v33 }
 0x5ac   :  { %4185 = vmatpush3.msra.mxu0 %v4270_v33  ;;  %4224 = vmatpush3.msra.mxu1 %v4270_v33 }
 0x5ad   :  { %4186 = vmatprep.subr.mxu0 %v4270_v33  ;;  %4225 = vmatprep.subr.mxu1 %v4270_v33 }
 0x5ae   :  { %4187 = vmatpush3.msra.mxu0 %v4270_v33  ;;  %4226 = vmatpush3.msra.mxu1 %v4270_v33 }
 0x5af   :  { %4188 = vmatprep.subr.mxu0 %v4270_v33  ;;  %4227 = vmatprep.subr.mxu1 %v4270_v33 }
 0x5b0   :  { %4189 = vmatpush3.msra.mxu0 %v4270_v33  ;;  %4228 = vmatpush3.msra.mxu1 %v4270_v33 }
 0x5b1   :  { %4190 = vmatprep.subr.mxu0 %v4270_v33  ;;  %4229 = vmatprep.subr.mxu1 %v4270_v33 }
 0x5b2   :  { %4191 = vmatpush3.msra.mxu0 %v4270_v33  ;;  %4230 = vmatpush3.msra.mxu1 %v4270_v33 }
 0x5b3   :  { %4192 = vmatprep.subr.mxu0 %v4270_v33  ;;  %4231 = vmatprep.subr.mxu1 %v4270_v33 }
 0x5b4   :  { %4193 = vmatpush3.msra.mxu0 %v4270_v33  ;;  %4232 = vmatpush3.msra.mxu1 %v4270_v33 }
 0x5b5   :  { %4194 = vmatprep.subr.mxu0 %v4270_v33  ;;  %4233 = vmatprep.subr.mxu1 %v4270_v33 }
 0x5b6   :  { %4195 = vmatpush3.msra.mxu0 %v4270_v33  ;;  %4234 = vmatpush3.msra.mxu1 %v4270_v33 }
 0x5b7   :  { %4196 = vmatprep.subr.mxu0 %v4270_v33  ;;  %4235 = vmatprep.subr.mxu1 %v4270_v33 }
 0x5b8   :  { %4197 = vmatpush3.msra.mxu0 %v4270_v33  ;;  %4236 = vmatpush3.msra.mxu1 %v4270_v33 }
 0x5b9   :  { %4198 = vmatprep.subr.mxu0 %v4270_v33  ;;  %4237 = vmatprep.subr.mxu1 %v4270_v33 }
 0x5ba   :  { %4199 = vmatpush3.msra.mxu0 %v4270_v33  ;;  %4238 = vmatpush3.msra.mxu1 %v4270_v33 }
 0x5bb   :  { %4200 = vmatprep.subr.mxu0 %v4270_v33 }
 0x5bc   :  { %4201 = vmatpush3.msra.mxu0 %v4270_v33 }
 0x5bd   :  { %4202 = vmatprep.subr.mxu0 %v4270_v33 }
 0x5be   :  { %4203 = vmatpush3.msra.mxu0 %v4270_v33 }
 0x65b   :  { %v4169_v63 = vpop.f32.mrf.mxu1 }
 0x65d   :  { %v4170_v5 = vpop.f32.mrf.mxu1 }
 0x65e   :  { %v4171_v11 = vadd.f32 %v4170_v5, %v4169_v63 }
 0x65f   :  { %v4134_v6 = vpop.f32.mrf.mxu0 }
 0x661   :  { %v4135_v10 = vpop.f32.mrf.mxu0 }
 0x662   :  { %v4136_v12 = vadd.f32 %v4135_v10, %v4134_v6 }
 0x664   :  { %v3673_v13 = vadd.f32 %v4171_v11, %v4136_v12 }
 0x666   :  { %v3676_v18 = vmul.f32 0.001953125, %v3673_v13 }
 0x668   :  { %3679 = vperm.xlu0 %4253, %v3676_v18  }
 0x66c   :  { %3845 = vperm.xlu0 %4253, %v3835_v59  }
 0x6e3   :  { %v3680_v60 = vpop.permute.xlu0 %3679 }
 0x6e4   :  { %v3682_v52 = vsub.f32 %v5137_v43, %v3680_v60  ;;  %v3683_v51 = vsub.f32 %v5135_v56, %v3680_v60  ;;  %v3684_v33 = vsub.f32 %v5144_v58, %v3680_v60  ;;  %v3685_v19 = vsub.f32 %v5141_v22, %v3680_v60 }
 0x6e6   :  { %v3689_v23 = vmul.f32 %v3685_v19, %v3685_v19  ;;  %v3687_v25 = vmul.f32 %v3683_v51, %v3683_v51  ;;  %v3688_v26 = vmul.f32 %v3684_v33, %v3684_v33  ;;  %v3686_v62 = vmul.f32 %v3682_v52, %v3682_v52 }
 0x6e7   :  { %v3846_v16 = vpop.permute.xlu0 %3845 }
 0x6e8   :  { %3754 = vmatprep.mubr.f32.mxu0 %v3689_v23  ;;  %3824 = vmatprep.mubr.f32.mxu1 %v3687_v25 }
 0x6e9   :  { %3755 = vmatmul.mubr.f32.vlgmr.msra.gmra.mxu0 %v3688_v26  ;;  %3825 = vmatmul.mubr.f32.vlgmr.msra.gmra.mxu1 %v3686_v62 }
 0x7a9   :  { %v4204_v61 = vpop.f32.mrf.mxu0  ;;  %v4239_v27 = vpop.f32.mrf.mxu1 }
 0x7ab   :  { %v4205_v8 = vpop.f32.mrf.mxu0  ;;  %v4240_v28 = vpop.f32.mrf.mxu1 }
 0x7ac   :  { %v4206_v9 = vadd.f32 %v4205_v8, %v4204_v61  ;;  %v4241_v29 = vadd.f32 %v4240_v28, %v4239_v27 }
 0x7ae   :  { %v3827_v21 = vadd.f32 %v4241_v29, %v4206_v9 }
 0x7b0   :  { %v3830_v24 = vmul.f32 0.001953125, %v3827_v21 }
 0x7b2   :  { %v3832_v0 = vadd.f32 1e-05, %v3830_v24 }
 0x7b4   :  { %4259 = vrsqrt.f32 %v3832_v0 }
 0x7c1   :  { %v4260_v30 = vpop.eup %4259 }
 0x7c2   :  { %v3834_v31 = vmul.f32 %v4260_v30, %v3831_v2 }
 0x7c4   :  { %3838 = vperm.xlu1 %4254, %v3834_v31  }
 0x83f   :  { %v3839_v32 = vpop.permute.xlu1 %3838 }
 0x840   :  { %v3841_v34 = vmul.f32 %v3839_v32, %v3682_v52  ;;  %v3842_v35 = vmul.f32 %v3839_v32, %v3683_v51  ;;  %v3852_v36 = vmul.f32 %v3839_v32, %v3684_v33  ;;  %v3853_v15 = vmul.f32 %v3839_v32, %v3685_v19 }
 0x842   :  { %v3848_v37 = vadd.f32 %v3846_v16, %v3841_v34  ;;  %v3849_v38 = vadd.f32 %v3846_v16, %v3842_v35  ;;  %v3854_v4 = vadd.f32 %v3852_v36, %v3846_v16  ;;  %v3855_v3 = vadd.f32 %v3853_v15, %v3846_v16 }
 0x844   :  { %v3850_v39 = vmax.f32 %v3848_v37, 0.0  ;;  %v3851_v40 = vmax.f32 %v3849_v38, 0.0  ;;  %v3856_v14 = vmax.f32 %v3854_v4, 0.0  ;;  %v3857_v17 = vmax.f32 %v3855_v3, 0.0 }
 0x846   :  { %3858 = vst [vmem:[%s5239_s8] sm:$0xff] %v3850_v39  ;;  %3859 = vst [vmem:[%s5239_s8 + $0x8] sm:$0xff] %v3851_v40 }
 0x847   :  { %3860 = vst [vmem:[%s5239_s8 + $0x10] sm:$0xff] %v3856_v14  ;;  %3861 = vst [vmem:[%s5239_s8 + $0x18] sm:$0xff] %v3857_v17 }

</bundles_post_ra>
